<compile_context>
chip_gen: v5e
topology: v5e:2x2
jax: 0.10.0
libtpu: 0.0.40
codegen_flags: <defaults>
</compile_context>

<pallas_src>
import math
import functools

import jax
import jax.numpy as jnp
from jax.experimental import pallas as pl
from jax.experimental.pallas import tpu as pltpu


_VMEM_LIMIT = 48 * 1024 * 1024          # fits v7x (64 MiB phys) and v5e/v6e


# ----------------------------- helpers --------------------------------------

def _pick_tile(dim, pref, align):
    """Largest tile <= pref that is align-aligned and divides dim, else full dim."""
    if dim <= pref:
        return dim
    t = (pref // align) * align
    while t >= align:
        if dim % t == 0:
            return t
        t -= align
    return dim


# ----------------------- tiled linear (matmul) kernels ------------------------

def _matmul_kernel_1k(x_ref, w_ref, b_ref, o_ref, *, activation):
    # K fits a single tile -> no accumulator, no k loop.
    y = jnp.dot(x_ref[...], w_ref[...], preferred_element_type=jnp.float32)
    y = y + b_ref[...].astype(jnp.float32)
    if activation == "relu":
        y = jnp.maximum(y, 0.0)
    o_ref[...] = y.astype(o_ref.dtype)


def _matmul_kernel_acc(x_ref, w_ref, b_ref, o_ref, acc_ref, *, activation):
    @pl.when(pl.program_id(2) == 0)
    def _init():
        acc_ref[...] = jnp.zeros_like(acc_ref)

    acc_ref[...] += jnp.dot(x_ref[...], w_ref[...],
                            preferred_element_type=jnp.float32)

    @pl.when(pl.program_id(2) == pl.num_programs(2) - 1)
    def _finalize():
        y = acc_ref[...] + b_ref[...].astype(jnp.float32)
        if activation == "relu":
            y = jnp.maximum(y, 0.0)
        o_ref[...] = y.astype(o_ref.dtype)


def linear(x, w, b, activation=None, out_dtype=jnp.bfloat16, tm=512, tn=512, tk=512):
    # x: (M, K) bf16, w: (K, N) bf16, b: (N,) f32   ->  (M, N) out_dtype
    M, K = x.shape
    N = w.shape[1]
    tm = _pick_tile(M, tm, 8)
    tn = _pick_tile(N, tn, 128)
    tk = _pick_tile(K, tk, 128)
    b2 = b.reshape(1, N)
    if K == tk:
        # M innermost: the weight block index is constant along it -> streamed once.
        return pl.pallas_call(
            functools.partial(_matmul_kernel_1k, activation=activation),
            out_shape=jax.ShapeDtypeStruct((M, N), out_dtype),
            grid=(N // tn, M // tm),
            in_specs=[pl.BlockSpec((tm, tk), lambda j, i: (i, 0)),
                      pl.BlockSpec((tk, tn), lambda j, i: (0, j)),
                      pl.BlockSpec((1, tn), lambda j, i: (0, j))],
            out_specs=pl.BlockSpec((tm, tn), lambda j, i: (i, j)),
            compiler_params=pltpu.CompilerParams(
                dimension_semantics=("parallel", "parallel"),
                vmem_limit_bytes=_VMEM_LIMIT),
        )(x, w, b2)
    return pl.pallas_call(
        functools.partial(_matmul_kernel_acc, activation=activation),
        out_shape=jax.ShapeDtypeStruct((M, N), out_dtype),
        grid=(M // tm, N // tn, K // tk),
        in_specs=[pl.BlockSpec((tm, tk), lambda i, j, k: (i, k)),
                  pl.BlockSpec((tk, tn), lambda i, j, k: (k, j)),
                  pl.BlockSpec((1, tn), lambda i, j, k: (0, j))],
        out_specs=pl.BlockSpec((tm, tn), lambda i, j, k: (i, j)),
        scratch_shapes=[pltpu.VMEM((tm, tn), jnp.float32)],
        compiler_params=pltpu.CompilerParams(
            dimension_semantics=("parallel", "parallel", "arbitrary"),
            vmem_limit_bytes=_VMEM_LIMIT),
    )(x, w, b2)


# -------------- fused matmul + residual-add + LayerNorm (epilogue) ------------

def _ln_epilogue(y, r_ref, g_ref, be_ref, eps):
    y = y + r_ref[...].astype(jnp.float32)
    mu = jnp.mean(y, axis=-1, keepdims=True)
    yc = y - mu
    var = jnp.mean(yc * yc, axis=-1, keepdims=True)
    z = yc * jax.lax.rsqrt(var + eps)
    return z * g_ref[...] + be_ref[...]


def _matmul_ln_kernel_1k(x_ref, w_ref, b_ref, r_ref, g_ref, be_ref, o_ref, *, eps):
    y = jnp.dot(x_ref[...], w_ref[...], preferred_element_type=jnp.float32)
    y = y + b_ref[...].astype(jnp.float32)
    o_ref[...] = _ln_epilogue(y, r_ref, g_ref, be_ref, eps).astype(o_ref.dtype)


def _matmul_ln_kernel_acc(x_ref, w_ref, b_ref, r_ref, g_ref, be_ref, o_ref,
                          acc_ref, *, eps):
    @pl.when(pl.program_id(1) == 0)
    def _init():
        acc_ref[...] = jnp.zeros_like(acc_ref)

    acc_ref[...] += jnp.dot(x_ref[...], w_ref[...],
                            preferred_element_type=jnp.float32)

    @pl.when(pl.program_id(1) == pl.num_programs(1) - 1)
    def _finalize():
        y = acc_ref[...] + b_ref[...].astype(jnp.float32)
        o_ref[...] = _ln_epilogue(y, r_ref, g_ref, be_ref, eps).astype(o_ref.dtype)


def linear_add_ln(x, w, b, res, gamma, beta, eps=1e-5,
                  out_dtype=jnp.bfloat16, tm=512, tk=512):
    # LN(res + x @ w + b); N (= hidden) kept as one tile so LN sees full rows.
    M, K = x.shape
    N = w.shape[1]
    tm = _pick_tile(M, tm, 8)
    tk = _pick_tile(K, tk, 128)
    b2 = b.reshape(1, N)
    g2 = gamma.reshape(1, N)
    be2 = beta.reshape(1, N)
    if K == tk:
        return pl.pallas_call(
            functools.partial(_matmul_ln_kernel_1k, eps=eps),
            out_shape=jax.ShapeDtypeStruct((M, N), out_dtype),
            grid=(M // tm,),
            in_specs=[pl.BlockSpec((tm, tk), lambda i: (i, 0)),
                      pl.BlockSpec((tk, N), lambda i: (0, 0)),
                      pl.BlockSpec((1, N), lambda i: (0, 0)),
                      pl.BlockSpec((tm, N), lambda i: (i, 0)),
                      pl.BlockSpec((1, N), lambda i: (0, 0)),
                      pl.BlockSpec((1, N), lambda i: (0, 0))],
            out_specs=pl.BlockSpec((tm, N), lambda i: (i, 0)),
            compiler_params=pltpu.CompilerParams(
                dimension_semantics=("parallel",),
                vmem_limit_bytes=_VMEM_LIMIT),
        )(x, w, b2, res, g2, be2)
    return pl.pallas_call(
        functools.partial(_matmul_ln_kernel_acc, eps=eps),
        out_shape=jax.ShapeDtypeStruct((M, N), out_dtype),
        grid=(M // tm, K // tk),
        in_specs=[pl.BlockSpec((tm, tk), lambda i, k: (i, k)),
                  pl.BlockSpec((tk, N), lambda i, k: (k, 0)),
                  pl.BlockSpec((1, N), lambda i, k: (0, 0)),
                  pl.BlockSpec((tm, N), lambda i, k: (i, 0)),
                  pl.BlockSpec((1, N), lambda i, k: (0, 0)),
                  pl.BlockSpec((1, N), lambda i, k: (0, 0))],
        out_specs=pl.BlockSpec((tm, N), lambda i, k: (i, 0)),
        scratch_shapes=[pltpu.VMEM((tm, N), jnp.float32)],
        compiler_params=pltpu.CompilerParams(
            dimension_semantics=("parallel", "arbitrary"),
            vmem_limit_bytes=_VMEM_LIMIT),
    )(x, w, b2, res, g2, be2)


# ----------------------------- attention kernels -----------------------------

def _sdpa(q, k, v, bias, scale):
    # q: (tq, Dh) bf16, k/v: (Sk, Dh) bf16, bias: (tq, Sk) f32 or None
    s = jax.lax.dot_general(q, k, (((1,), (1,)), ((), ())),
                            preferred_element_type=jnp.float32) * scale
    if bias is not None:
        s = s + bias
    # guard fully-masked rows against -inf/NaN
    m = jnp.maximum(jnp.max(s, axis=-1, keepdims=True), -1e30)
    e = jnp.exp(s - m)
    den = jnp.maximum(jnp.sum(e, axis=-1, keepdims=True), 1e-30)
    p = (e * pl.reciprocal(den, approx=True)).astype(v.dtype)
    return jnp.dot(p, v, preferred_element_type=jnp.float32)


def _self_attn_kernel(q_ref, k_ref, v_ref, pad_ref, o_ref, *, scale):
    tq = q_ref.shape[2]
    Sk = k_ref.shape[2]
    q0 = pl.program_id(2) * tq
    rows = q0 + jax.lax.broadcasted_iota(jnp.int32, (tq, Sk), 0)
    cols = jax.lax.broadcasted_iota(jnp.int32, (tq, Sk), 1)
    bias = jnp.where(cols > rows, -jnp.inf, 0.0) + pad_ref[0]   # causal + key pad
    o_ref[0, 0] = _sdpa(q_ref[0, 0], k_ref[0, 0], v_ref[0, 0],
                        bias, scale).astype(o_ref.dtype)


def _cross_attn_kernel(q_ref, k_ref, v_ref, o_ref, *, scale):
    o_ref[0, 0] = _sdpa(q_ref[0, 0], k_ref[0, 0], v_ref[0, 0],
                        None, scale).astype(o_ref.dtype)


def _attention_call(kernel, q, k, v, extra_inputs, extra_specs, tq):
    B, H, Sq, Dh = q.shape
    Sk = k.shape[2]
    return pl.pallas_call(
        kernel,
        out_shape=jax.ShapeDtypeStruct((B, H, Sq, Dh), jnp.bfloat16),
        grid=(B, H, Sq // tq),
        in_specs=[pl.BlockSpec((1, 1, tq, Dh), lambda b, h, qi: (b, h, qi, 0)),
                  pl.BlockSpec((1, 1, Sk, Dh), lambda b, h, qi: (b, h, 0, 0)),
                  pl.BlockSpec((1, 1, Sk, Dh), lambda b, h, qi: (b, h, 0, 0))]
                 + extra_specs,
        out_specs=pl.BlockSpec((1, 1, tq, Dh), lambda b, h, qi: (b, h, qi, 0)),
        compiler_params=pltpu.CompilerParams(
            dimension_semantics=("parallel", "parallel", "parallel"),
            vmem_limit_bytes=_VMEM_LIMIT),
    )(q, k, v, *extra_inputs)


def self_attention_block(x, p, pad_bias, nhead, ln_g, ln_b):
    # returns LN(x + SelfAttn(x)) with the LN fused into the wo projection
    B, S, E = x.shape
    Dh = E // nhead
    x2d = x.reshape(B * S, E)
    qkv = linear(x2d, p["w_qkv"], p["b_qkv"]).reshape(B, S, 3, nhead, Dh)
    # TODO(synk): head split/merge transposes stay in XLA; could be folded into a
    #             head-major matmul epilogue writing (B, H, S, Dh) directly.
    q = qkv[:, :, 0].transpose(0, 2, 1, 3)
    k = qkv[:, :, 1].transpose(0, 2, 1, 3)
    v = qkv[:, :, 2].transpose(0, 2, 1, 3)
    tq = _pick_tile(S, 256, 8)
    o = _attention_call(
        functools.partial(_self_attn_kernel, scale=1.0 / math.sqrt(Dh)),
        q, k, v,
        extra_inputs=[pad_bias],
        extra_specs=[pl.BlockSpec((1, 1, S), lambda b, h, qi: (b, 0, 0))],
        tq=tq)
    o2d = o.transpose(0, 2, 1, 3).reshape(B * S, E)
    return linear_add_ln(o2d, p["wo"], p["bo"], x2d, ln_g, ln_b).reshape(B, S, E)


def cross_attention_block(x, memory, p, nhead, ln_g, ln_b):
    # returns LN(x + CrossAttn(x, memory)); no memory mask (matches reference)
    B, Sq, E = x.shape
    Sk = memory.shape[1]
    Dh = E // nhead
    x2d = x.reshape(B * Sq, E)
    q = linear(x2d, p["wq"], p["bq"]).reshape(B, Sq, nhead, Dh).transpose(0, 2, 1, 3)
    kv = linear(memory.reshape(B * Sk, E), p["w_kv"], p["b_kv"]
                ).reshape(B, Sk, 2, nhead, Dh)
    k = kv[:, :, 0].transpose(0, 2, 1, 3)
    v = kv[:, :, 1].transpose(0, 2, 1, 3)
    tq = _pick_tile(Sq, 256, 8)
    o = _attention_call(
        functools.partial(_cross_attn_kernel, scale=1.0 / math.sqrt(Dh)),
        q, k, v, extra_inputs=[], extra_specs=[], tq=tq)
    o2d = o.transpose(0, 2, 1, 3).reshape(B * Sq, E)
    return linear_add_ln(o2d, p["wo"], p["bo"], x2d, ln_g, ln_b).reshape(B, Sq, E)


# --------------------- positional encoding (in-kernel PE) --------------------

def _pos_encoding_kernel(tok_ref, o_ref, *, emb_size):
    # Faithfully replicates the reference's `pos_embedding[:size(0)]` broadcast:
    # batch row b gets the PE vector of *position b*, broadcast over the sequence.
    pos = pl.program_id(0).astype(jnp.float32)
    j = jax.lax.broadcasted_iota(jnp.int32, (1, emb_size), 1)
    parity = j % 2
    expo = (j - parity).astype(jnp.float32) * (-math.log(10000.0) / emb_size)
    angle = pos * jnp.exp(expo)
    pe = jnp.where(parity == 0, jnp.sin(angle), jnp.cos(angle))
    o_ref[0] = (tok_ref[0].astype(jnp.float32) + pe).astype(o_ref.dtype)


def add_positional_encoding(tok):
    B, S, E = tok.shape
    return pl.pallas_call(
        functools.partial(_pos_encoding_kernel, emb_size=E),
        out_shape=jax.ShapeDtypeStruct((B, S, E), jnp.bfloat16),
        grid=(B,),
        in_specs=[pl.BlockSpec((1, S, E), lambda b: (b, 0, 0))],
        out_specs=pl.BlockSpec((1, S, E), lambda b: (b, 0, 0)),
        compiler_params=pltpu.CompilerParams(
            dimension_semantics=("parallel",),
            vmem_limit_bytes=_VMEM_LIMIT),
    )(tok)


# -------- fused output projection + softmax(dim=2) + permute(0,2,1) ----------

def _proj_softmax_kernel(x_ref, wt_ref, b_ref, o_ref):
    # x: (1, ts, E) bf16, wt: (V, E) bf16, b: (V, 1) f32, out: (1, V, ts) f32.
    # MXU emits (V, ts) directly (weight stored transposed) -> no (ts, V).T store.
    logits = jax.lax.dot_general(wt_ref[...], x_ref[0],
                                 (((1,), (1,)), ((), ())),
                                 preferred_element_type=jnp.float32)
    logits = logits + b_ref[...]
    m = jnp.max(logits, axis=0, keepdims=True)
    e = jnp.exp(logits - m)
    o_ref[0] = (e / jnp.sum(e, axis=0, keepdims=True)).astype(o_ref.dtype)


def output_head(x, wf_t, bf):
    # TODO(synk): for very large vocabularies, tile over V with a two-pass /
    #             online softmax instead of blocking the full (V, E) weight.
    B, S, E = x.shape
    V = wf_t.shape[0]
    ts = _pick_tile(S, 256, 128)
    return pl.pallas_call(
        _proj_softmax_kernel,
        out_shape=jax.ShapeDtypeStruct((B, V, S), jnp.float32),
        grid=(B, S // ts),
        in_specs=[pl.BlockSpec((1, ts, E), lambda b, s: (b, s, 0)),
                  pl.BlockSpec((V, E), lambda b, s: (0, 0)),
                  pl.BlockSpec((V, 1), lambda b, s: (0, 0))],
        out_specs=pl.BlockSpec((1, V, ts), lambda b, s: (b, 0, s)),
        compiler_params=pltpu.CompilerParams(
            dimension_semantics=("parallel", "parallel"),
            vmem_limit_bytes=_VMEM_LIMIT),
    )(x, wf_t, bf.reshape(V, 1))


# ----------------------------- parameters ------------------------------------

def init_params(key, hidden, nhead, num_layers, vocab_size, d_ff=2048):
    def rnd(shape, scale, dtype=jnp.float32):
        nonlocal key
        key, sub = jax.random.split(key)
        return (scale * jax.random.normal(sub, shape, jnp.float32)).astype(dtype)

    wdt = jnp.bfloat16      # matmul weights in bf16 (native MXU mode, half the DMA)

    params = {}
    emb = rnd((vocab_size, hidden), 1.0)
    params["embedding"] = emb.at[0].set(0.0)        # padding_idx=0, frozen

    layers = []
    for _ in range(num_layers):
        layers.append({
            "self": {
                "w_qkv": rnd((hidden, 3 * hidden), 0.05, wdt),
                "b_qkv": rnd((3 * hidden,), 0.01),
                "wo": rnd((hidden, hidden), 0.05, wdt), "bo": rnd((hidden,), 0.01),
            },
            "cross": {
                "wq": rnd((hidden, hidden), 0.05, wdt), "bq": rnd((hidden,), 0.01),
                "w_kv": rnd((hidden, 2 * hidden), 0.05, wdt),
                "b_kv": rnd((2 * hidden,), 0.01),
                "wo": rnd((hidden, hidden), 0.05, wdt), "bo": rnd((hidden,), 0.01),
            },
            "w1": rnd((hidden, d_ff), 0.05, wdt), "b1": rnd((d_ff,), 0.01),
            "w2": rnd((d_ff, hidden), 0.05 / math.sqrt(d_ff / hidden), wdt),
            "b2": rnd((hidden,), 0.01),
            "ln1_g": jnp.ones((hidden,), jnp.float32), "ln1_b": jnp.zeros((hidden,), jnp.float32),
            "ln2_g": jnp.ones((hidden,), jnp.float32), "ln2_b": jnp.zeros((hidden,), jnp.float32),
            "ln3_g": jnp.ones((hidden,), jnp.float32), "ln3_b": jnp.zeros((hidden,), jnp.float32),
        })
    params["layers"] = layers
    params["wf_t"] = rnd((vocab_size, hidden), 0.05, wdt)   # stored transposed (V, E)
    params["bf"] = rnd((vocab_size,), 0.01)
    return params


# ------------------------------- forward --------------------------------------

def feature_transformer_forward(params, features, words, hidden, nhead):
    B, S = words.shape
    E = hidden

    # ---- generate_mask: key-padding bias only; causal mask is built in-kernel
    pad_bias = jnp.where(words == 0, -jnp.inf, 0.0).astype(jnp.float32).reshape(B, 1, S)

    # ---- embedding gather (XLA) + in-kernel positional encoding (dropout = id)
    # TODO(synk): embedding row gather stays in XLA (would need a DMA-gather kernel).
    tok = params["embedding"][words]                              # (B, S, E) f32
    x = add_positional_encoding(tok)                              # (B, S, E) bf16
    memory = features.astype(jnp.bfloat16)

    # ---- TransformerDecoder stack (post-norm, relu FFN) ----
    for lyr in params["layers"]:
        x = self_attention_block(x, lyr["self"], pad_bias, nhead,
                                 lyr["ln1_g"], lyr["ln1_b"])
        x = cross_attention_block(x, memory, lyr["cross"], nhead,
                                  lyr["ln2_g"], lyr["ln2_b"])
        x2d = x.reshape(B * S, E)
        h = linear(x2d, lyr["w1"], lyr["b1"], activation="relu")
        x = linear_add_ln(h, lyr["w2"], lyr["b2"], x2d,
                          lyr["ln3_g"], lyr["ln3_b"]).reshape(B, S, E)

    # ---- fused output projection + softmax(dim=2) + permute(0, 2, 1) ----
    return output_head(x, params["wf_t"], params["bf"])          # (B, V, S) f32


# --------------------------------- main ----------------------------------------

if __name__ == "__main__":
    B, S, HIDDEN, NHEAD, NLAYERS, VOCAB, MEM = 2, 8, 32, 4, 2, 16, 8

    key = jax.random.PRNGKey(0)
    kp, kf, kw = jax.random.split(key, 3)

    params = init_params(kp, HIDDEN, NHEAD, NLAYERS, VOCAB)
    features = jax.random.normal(kf, (B, MEM, HIDDEN), jnp.float32)
    words = jax.random.randint(kw, (B, S), 0, VOCAB)
    words = words.at[:, 0].set(1)          # BOS token; first key never padded
    words = words.at[:, -2:].set(0)        # trailing padding tokens

    fwd = jax.jit(functools.partial(feature_transformer_forward,
                                    hidden=HIDDEN, nhead=NHEAD))
    out = jax.block_until_ready(fwd(params, features, words))

    assert out.shape == (B, VOCAB, S), out.shape
    assert bool(jnp.all(jnp.isfinite(out)))
    # softmax was over the vocab dim before the permute -> sums over axis 1 are 1
    assert bool(jnp.allclose(jnp.sum(out, axis=1), 1.0, atol=1e-4))
    print("KERNEL_OK")
</pallas_src>

<mosaic_0001>
module attributes {stable_mosaic.version = 11 : i64} {
  func.func @_pos_encoding_kernel(%arg0: i32, %arg1: memref<1x8x32xf32, #tpu.memory_space<vmem>>, %arg2: memref<1x8x32xbf16, #tpu.memory_space<vmem>>) attributes {dimension_semantics = [#tpu.dimension_semantics<parallel>], iteration_bounds = array<i64: 2>, scalar_prefetch = 0 : i64, scratch_operands = 0 : i64, tpu.core_type = #tpu.core_type<tc>, window_params = [{transform_indices = @transform_0, window_bounds = array<i64: 1, 8, 32>}, {transform_indices = @transform_1, window_bounds = array<i64: 1, 8, 32>}]} {
    %0 = arith.sitofp %arg0 : i32 to f32
    %1 = tpu.iota {dimensions = array<i32: 1>} : vector<1x32xi32>
    %c2_i32 = arith.constant 2 : i32
    %c0_i32 = arith.constant 0 : i32
    %2 = arith.cmpi eq, %c2_i32, %c0_i32 : i32
    %c1_i32 = arith.constant 1 : i32
    %3 = arith.select %2, %c1_i32, %c2_i32 : i32
    %4 = vector.broadcast %3 : i32 to vector<1x32xi32>
    %5 = arith.remsi %1, %4 : vector<1x32xi32>
    %c0_i32_0 = arith.constant 0 : i32
    %6 = vector.broadcast %c0_i32_0 : i32 to vector<1x32xi32>
    %7 = arith.cmpi ne, %5, %6 : vector<1x32xi32>
    %c0_i32_1 = arith.constant 0 : i32
    %8 = vector.broadcast %c0_i32_1 : i32 to vector<1x32xi32>
    %9 = arith.cmpi slt, %5, %8 : vector<1x32xi32>
    %c0_i32_2 = arith.constant 0 : i32
    %10 = arith.cmpi slt, %3, %c0_i32_2 : i32
    %11 = vector.broadcast %10 : i1 to vector<1x32xi1>
    %12 = vector.broadcast %11 : vector<1x32xi1> to vector<1x32xi1>
    %13 = arith.xori %9, %12 : vector<1x32xi1>
    %14 = arith.andi %13, %7 : vector<1x32xi1>
    %15 = vector.broadcast %3 : i32 to vector<1x32xi32>
    %16 = arith.addi %5, %15 : vector<1x32xi32>
    %17 = arith.select %14, %16, %5 : vector<1x32xi1>, vector<1x32xi32>
    %18 = arith.subi %1, %17 : vector<1x32xi32>
    %19 = arith.sitofp %18 : vector<1x32xi32> to vector<1x32xf32>
    %cst = arith.constant -0.287823141 : f32
    %20 = vector.broadcast %cst : f32 to vector<1x32xf32>
    %21 = arith.mulf %19, %20 : vector<1x32xf32>
    %22 = math.exp %21 : vector<1x32xf32>
    %23 = vector.broadcast %0 : f32 to vector<1x32xf32>
    %24 = arith.mulf %23, %22 : vector<1x32xf32>
    %c0_i32_3 = arith.constant 0 : i32
    %25 = vector.broadcast %c0_i32_3 : i32 to vector<1x32xi32>
    %26 = arith.cmpi eq, %17, %25 : vector<1x32xi32>
    %27 = math.sin %24 : vector<1x32xf32>
    %28 = math.cos %24 : vector<1x32xf32>
    %29 = arith.select %26, %27, %28 : vector<1x32xi1>, vector<1x32xf32>
    %c0 = arith.constant 0 : index
    %c0_4 = arith.constant 0 : index
    %c0_5 = arith.constant 0 : index
    %30 = vector.load %arg1[%c0, %c0_4, %c0_5] : memref<1x8x32xf32, #tpu.memory_space<vmem>>, vector<1x8x32xf32>
    %31 = vector.shape_cast %30 : vector<1x8x32xf32> to vector<8x32xf32>
    %32 = vector.broadcast %29 : vector<1x32xf32> to vector<8x32xf32>
    %33 = arith.addf %31, %32 : vector<8x32xf32>
    %34 = arith.truncf %33 : vector<8x32xf32> to vector<8x32xbf16>
    %c0_6 = arith.constant 0 : index
    %c0_7 = arith.constant 0 : index
    %c0_8 = arith.constant 0 : index
    %35 = vector.load %arg2[%c0_6, %c0_7, %c0_8] : memref<1x8x32xbf16, #tpu.memory_space<vmem>>, vector<1x8x32xbf16>
    %36 = vector.shape_cast %35 : vector<1x8x32xbf16> to vector<8x32xbf16>
    %37 = vector.shape_cast %34 : vector<8x32xbf16> to vector<1x8x32xbf16>
    tpu.vector_store %arg2[%c0_6, %c0_7, %c0_8], %37 {strides = array<i32>} : memref<1x8x32xbf16, #tpu.memory_space<vmem>>, vector<1x8x32xbf16>,
    return
  }
  func.func @transform_0(%arg0: i32) -> (i32, i32, i32) {
    %c0_i32 = arith.constant 0 : i32
    %c0_i32_0 = arith.constant 0 : i32
    %c0_i32_1 = arith.constant 0 : i32
    return %arg0, %c0_i32, %c0_i32_0 : i32, i32, i32
  }
  func.func @transform_1(%arg0: i32) -> (i32, i32, i32) {
    %c0_i32 = arith.constant 0 : i32
    %c0_i32_0 = arith.constant 0 : i32
    %c0_i32_1 = arith.constant 0 : i32
    return %arg0, %c0_i32, %c0_i32_0 : i32, i32, i32
  }
}

module attributes {stable_mosaic.version = 11 : i64} {
  func.func @_matmul_kernel_1k(%arg0: i32, %arg1: i32, %arg2: memref<16x32xbf16, #tpu.memory_space<vmem>>, %arg3: memref<32x96xbf16, #tpu.memory_space<vmem>>, %arg4: memref<1x96xf32, #tpu.memory_space<vmem>>, %arg5: memref<16x96xbf16, #tpu.memory_space<vmem>>) attributes {dimension_semantics = [#tpu.dimension_semantics<parallel>, #tpu.dimension_semantics<parallel>], iteration_bounds = array<i64: 1, 1>, scalar_prefetch = 0 : i64, scratch_operands = 0 : i64, tpu.core_type = #tpu.core_type<tc>, window_params = [{transform_indices = @transform_0, window_bounds = array<i64: 16, 32>}, {transform_indices = @transform_1, window_bounds = array<i64: 32, 96>}, {transform_indices = @transform_2, window_bounds = array<i64: 1, 96>}, {transform_indices = @transform_3, window_bounds = array<i64: 16, 96>}]} {
    %c0 = arith.constant 0 : index
    %c0_0 = arith.constant 0 : index
    %0 = vector.load %arg2[%c0, %c0_0] : memref<16x32xbf16, #tpu.memory_space<vmem>>, vector<16x32xbf16>
    %c0_1 = arith.constant 0 : index
    %c0_2 = arith.constant 0 : index
    %1 = vector.load %arg3[%c0_1, %c0_2] : memref<32x96xbf16, #tpu.memory_space<vmem>>, vector<32x96xbf16>
    %cst = arith.constant dense<0.000000e+00> : vector<16x96xf32>
    %2 = tpu.matmul %0, %1, %cst {dimension_numbers = #tpu.dot_dimension_numbers<[1], [0], [0], [1], [0, 0, 1, 1], [], []>} : vector<16x32xbf16>, vector<32x96xbf16>, vector<16x96xf32> -> vector<16x96xf32>
    %c0_3 = arith.constant 0 : index
    %c0_4 = arith.constant 0 : index
    %3 = vector.load %arg4[%c0_3, %c0_4] : memref<1x96xf32, #tpu.memory_space<vmem>>, vector<1x96xf32>
    %4 = vector.broadcast %3 : vector<1x96xf32> to vector<16x96xf32>
    %5 = arith.addf %2, %4 : vector<16x96xf32>
    %6 = arith.truncf %5 : vector<16x96xf32> to vector<16x96xbf16>
    %c0_5 = arith.constant 0 : index
    %c0_6 = arith.constant 0 : index
    %7 = vector.load %arg5[%c0_5, %c0_6] : memref<16x96xbf16, #tpu.memory_space<vmem>>, vector<16x96xbf16>
    tpu.vector_store %arg5[%c0_5, %c0_6], %6 {strides = array<i32>} : memref<16x96xbf16, #tpu.memory_space<vmem>>, vector<16x96xbf16>,
    return
  }
  func.func @transform_0(%arg0: i32, %arg1: i32) -> (i32, i32) {
    %c0_i32 = arith.constant 0 : i32
    %c0_i32_0 = arith.constant 0 : i32
    return %arg1, %c0_i32 : i32, i32
  }
  func.func @transform_1(%arg0: i32, %arg1: i32) -> (i32, i32) {
    %c0_i32 = arith.constant 0 : i32
    %c0_i32_0 = arith.constant 0 : i32
    return %c0_i32, %arg0 : i32, i32
  }
  func.func @transform_2(%arg0: i32, %arg1: i32) -> (i32, i32) {
    %c0_i32 = arith.constant 0 : i32
    %c0_i32_0 = arith.constant 0 : i32
    return %c0_i32, %arg0 : i32, i32
  }
  func.func @transform_3(%arg0: i32, %arg1: i32) -> (i32, i32) {
    %c0_i32 = arith.constant 0 : i32
    return %arg1, %arg0 : i32, i32
  }
}

module attributes {stable_mosaic.version = 11 : i64} {
  func.func @_self_attn_kernel(%arg0: i32, %arg1: i32, %arg2: i32, %arg3: memref<1x1x8x8xbf16, #tpu.memory_space<vmem>>, %arg4: memref<1x1x8x8xbf16, #tpu.memory_space<vmem>>, %arg5: memref<1x1x8x8xbf16, #tpu.memory_space<vmem>>, %arg6: memref<1x1x8xf32, #tpu.memory_space<vmem>>, %arg7: memref<1x1x8x8xbf16, #tpu.memory_space<vmem>>) attributes {dimension_semantics = [#tpu.dimension_semantics<parallel>, #tpu.dimension_semantics<parallel>, #tpu.dimension_semantics<parallel>], iteration_bounds = array<i64: 2, 4, 1>, scalar_prefetch = 0 : i64, scratch_operands = 0 : i64, tpu.core_type = #tpu.core_type<tc>, window_params = [{transform_indices = @transform_0, window_bounds = array<i64: 1, 1, 8, 8>}, {transform_indices = @transform_1, window_bounds = array<i64: 1, 1, 8, 8>}, {transform_indices = @transform_2, window_bounds = array<i64: 1, 1, 8, 8>}, {transform_indices = @transform_3, window_bounds = array<i64: 1, 1, 8>}, {transform_indices = @transform_4, window_bounds = array<i64: 1, 1, 8, 8>}]} {
    %c8_i32 = arith.constant 8 : i32
    %0 = arith.muli %arg2, %c8_i32 : i32
    %1 = tpu.iota {dimensions = array<i32: 0>} : vector<8x8xi32>
    %2 = vector.broadcast %0 : i32 to vector<8x8xi32>
    %3 = arith.addi %2, %1 : vector<8x8xi32>
    %4 = tpu.iota {dimensions = array<i32: 1>} : vector<8x8xi32>
    %5 = arith.cmpi sgt, %4, %3 : vector<8x8xi32>
    %cst = arith.constant 0xFF800000 : f32
    %cst_0 = arith.constant 0.000000e+00 : f32
    %6 = vector.broadcast %cst : f32 to vector<8x8xf32>
    %7 = vector.broadcast %cst_0 : f32 to vector<8x8xf32>
    %8 = arith.select %5, %6, %7 : vector<8x8xi1>, vector<8x8xf32>
    %c0 = arith.constant 0 : index
    %c0_1 = arith.constant 0 : index
    %c0_2 = arith.constant 0 : index
    %9 = vector.load %arg6[%c0, %c0_1, %c0_2] : memref<1x1x8xf32, #tpu.memory_space<vmem>>, vector<1x1x8xf32>
    %10 = vector.shape_cast %9 : vector<1x1x8xf32> to vector<1x8xf32>
    %11 = vector.broadcast %10 : vector<1x8xf32> to vector<8x8xf32>
    %12 = arith.addf %8, %11 : vector<8x8xf32>
    %c0_3 = arith.constant 0 : index
    %c0_4 = arith.constant 0 : index
    %c0_5 = arith.constant 0 : index
    %c0_6 = arith.constant 0 : index
    %13 = vector.load %arg3[%c0_3, %c0_4, %c0_5, %c0_6] : memref<1x1x8x8xbf16, #tpu.memory_space<vmem>>, vector<1x1x8x8xbf16>
    %14 = vector.shape_cast %13 : vector<1x1x8x8xbf16> to vector<8x8xbf16>
    %c0_7 = arith.constant 0 : index
    %c0_8 = arith.constant 0 : index
    %c0_9 = arith.constant 0 : index
    %c0_10 = arith.constant 0 : index
    %15 = vector.load %arg4[%c0_7, %c0_8, %c0_9, %c0_10] : memref<1x1x8x8xbf16, #tpu.memory_space<vmem>>, vector<1x1x8x8xbf16>
    %16 = vector.shape_cast %15 : vector<1x1x8x8xbf16> to vector<8x8xbf16>
    %c0_11 = arith.constant 0 : index
    %c0_12 = arith.constant 0 : index
    %c0_13 = arith.constant 0 : index
    %c0_14 = arith.constant 0 : index
    %17 = vector.load %arg5[%c0_11, %c0_12, %c0_13, %c0_14] : memref<1x1x8x8xbf16, #tpu.memory_space<vmem>>, vector<1x1x8x8xbf16>
    %18 = vector.shape_cast %17 : vector<1x1x8x8xbf16> to vector<8x8xbf16>
    %cst_15 = arith.constant dense<0.000000e+00> : vector<8x8xf32>
    %19 = tpu.matmul %14, %16, %cst_15 {dimension_numbers = #tpu.dot_dimension_numbers<[1], [1], [0], [0], [0, 0, 1, 0], [], []>} : vector<8x8xbf16>, vector<8x8xbf16>, vector<8x8xf32> -> vector<8x8xf32>
    %cst_16 = arith.constant 0.353553385 : f32
    %20 = vector.broadcast %cst_16 : f32 to vector<8x8xf32>
    %21 = arith.mulf %19, %20 : vector<8x8xf32>
    %22 = arith.addf %21, %12 : vector<8x8xf32>
    %cst_17 = arith.constant dense<0xFF800000> : vector<8xf32>
    %23 = vector.multi_reduction <maximumf>, %22, %cst_17 [1] : vector<8x8xf32> to vector<8xf32>
    %24 = vector.shape_cast %23 : vector<8xf32> to vector<8x1xf32>
    %cst_18 = arith.constant -1.000000e+30 : f32
    %25 = vector.broadcast %cst_18 : f32 to vector<8x1xf32>
    %26 = arith.maximumf %24, %25 : vector<8x1xf32>
    %27 = vector.broadcast %26 : vector<8x1xf32> to vector<8x8xf32>
    %28 = arith.subf %22, %27 : vector<8x8xf32>
    %29 = math.exp %28 : vector<8x8xf32>
    %cst_19 = arith.constant dense<0.000000e+00> : vector<8xf32>
    %30 = vector.multi_reduction <add>, %29, %cst_19 [1] : vector<8x8xf32> to vector<8xf32>
    %31 = vector.shape_cast %30 : vector<8xf32> to vector<8x1xf32>
    %cst_20 = arith.constant 1.000000e-30 : f32
    %32 = vector.broadcast %cst_20 : f32 to vector<8x1xf32>
    %33 = arith.maximumf %31, %32 : vector<8x1xf32>
    %34 = tpu.reciprocal %33 {approx = true} : vector<8x1xf32> -> vector<8x1xf32>
    %35 = vector.broadcast %34 : vector<8x1xf32> to vector<8x8xf32>
    %36 = arith.mulf %29, %35 : vector<8x8xf32>
    %37 = arith.truncf %36 : vector<8x8xf32> to vector<8x8xbf16>
    %cst_21 = arith.constant dense<0.000000e+00> : vector<8x8xf32>
    %38 = tpu.matmul %37, %18, %cst_21 {dimension_numbers = #tpu.dot_dimension_numbers<[1], [0], [0], [1], [0, 0, 1, 1], [], []>} : vector<8x8xbf16>, vector<8x8xbf16>, vector<8x8xf32> -> vector<8x8xf32>
    %39 = arith.truncf %38 : vector<8x8xf32> to vector<8x8xbf16>
    %c0_22 = arith.constant 0 : index
    %c0_23 = arith.constant 0 : index
    %c0_24 = arith.constant 0 : index
    %c0_25 = arith.constant 0 : index
    %40 = vector.load %arg7[%c0_22, %c0_23, %c0_24, %c0_25] : memref<1x1x8x8xbf16, #tpu.memory_space<vmem>>, vector<1x1x8x8xbf16>
    %41 = vector.shape_cast %40 : vector<1x1x8x8xbf16> to vector<8x8xbf16>
    %42 = vector.shape_cast %39 : vector<8x8xbf16> to vector<1x1x8x8xbf16>
    tpu.vector_store %arg7[%c0_22, %c0_23, %c0_24, %c0_25], %42 {strides = array<i32>} : memref<1x1x8x8xbf16, #tpu.memory_space<vmem>>, vector<1x1x8x8xbf16>,
    return
  }
  func.func @transform_0(%arg0: i32, %arg1: i32, %arg2: i32) -> (i32, i32, i32, i32) {
    %c0_i32 = arith.constant 0 : i32
    %c0_i32_0 = arith.constant 0 : i32
    return %arg0, %arg1, %arg2, %c0_i32 : i32, i32, i32, i32
  }
  func.func @transform_1(%arg0: i32, %arg1: i32, %arg2: i32) -> (i32, i32, i32, i32) {
    %c0_i32 = arith.constant 0 : i32
    %c0_i32_0 = arith.constant 0 : i32
    %c0_i32_1 = arith.constant 0 : i32
    return %arg0, %arg1, %c0_i32, %c0_i32_0 : i32, i32, i32, i32
  }
  func.func @transform_2(%arg0: i32, %arg1: i32, %arg2: i32) -> (i32, i32, i32, i32) {
    %c0_i32 = arith.constant 0 : i32
    %c0_i32_0 = arith.constant 0 : i32
    %c0_i32_1 = arith.constant 0 : i32
    return %arg0, %arg1, %c0_i32, %c0_i32_0 : i32, i32, i32, i32
  }
  func.func @transform_3(%arg0: i32, %arg1: i32, %arg2: i32) -> (i32, i32, i32) {
    %c0_i32 = arith.constant 0 : i32
    %c0_i32_0 = arith.constant 0 : i32
    %c0_i32_1 = arith.constant 0 : i32
    return %arg0, %c0_i32, %c0_i32_0 : i32, i32, i32
  }
  func.func @transform_4(%arg0: i32, %arg1: i32, %arg2: i32) -> (i32, i32, i32, i32) {
    %c0_i32 = arith.constant 0 : i32
    %c0_i32_0 = arith.constant 0 : i32
    return %arg0, %arg1, %arg2, %c0_i32 : i32, i32, i32, i32
  }
}

module attributes {stable_mosaic.version = 11 : i64} {
  func.func @_matmul_ln_kernel_1k(%arg0: i32, %arg1: memref<16x32xbf16, #tpu.memory_space<vmem>>, %arg2: memref<32x32xbf16, #tpu.memory_space<vmem>>, %arg3: memref<1x32xf32, #tpu.memory_space<vmem>>, %arg4: memref<16x32xbf16, #tpu.memory_space<vmem>>, %arg5: memref<1x32xf32, #tpu.memory_space<vmem>>, %arg6: memref<1x32xf32, #tpu.memory_space<vmem>>, %arg7: memref<16x32xbf16, #tpu.memory_space<vmem>>) attributes {dimension_semantics = [#tpu.dimension_semantics<parallel>], iteration_bounds = array<i64: 1>, scalar_prefetch = 0 : i64, scratch_operands = 0 : i64, tpu.core_type = #tpu.core_type<tc>, window_params = [{transform_indices = @transform_0, window_bounds = array<i64: 16, 32>}, {pipeline_mode = #tpu.pipeline_mode<synchronous>, transform_indices = @transform_1, window_bounds = array<i64: 32, 32>}, {pipeline_mode = #tpu.pipeline_mode<synchronous>, transform_indices = @transform_2, window_bounds = array<i64: 1, 32>}, {transform_indices = @transform_3, window_bounds = array<i64: 16, 32>}, {pipeline_mode = #tpu.pipeline_mode<synchronous>, transform_indices = @transform_4, window_bounds = array<i64: 1, 32>}, {pipeline_mode = #tpu.pipeline_mode<synchronous>, transform_indices = @transform_5, window_bounds = array<i64: 1, 32>}, {transform_indices = @transform_6, window_bounds = array<i64: 16, 32>}]} {
    %c0 = arith.constant 0 : index
    %c0_0 = arith.constant 0 : index
    %0 = vector.load %arg1[%c0, %c0_0] : memref<16x32xbf16, #tpu.memory_space<vmem>>, vector<16x32xbf16>
    %c0_1 = arith.constant 0 : index
    %c0_2 = arith.constant 0 : index
    %1 = vector.load %arg2[%c0_1, %c0_2] : memref<32x32xbf16, #tpu.memory_space<vmem>>, vector<32x32xbf16>
    %cst = arith.constant dense<0.000000e+00> : vector<16x32xf32>
    %2 = tpu.matmul %0, %1, %cst {dimension_numbers = #tpu.dot_dimension_numbers<[1], [0], [0], [1], [0, 0, 1, 1], [], []>} : vector<16x32xbf16>, vector<32x32xbf16>, vector<16x32xf32> -> vector<16x32xf32>
    %c0_3 = arith.constant 0 : index
    %c0_4 = arith.constant 0 : index
    %3 = vector.load %arg3[%c0_3, %c0_4] : memref<1x32xf32, #tpu.memory_space<vmem>>, vector<1x32xf32>
    %4 = vector.broadcast %3 : vector<1x32xf32> to vector<16x32xf32>
    %5 = arith.addf %2, %4 : vector<16x32xf32>
    %c0_5 = arith.constant 0 : index
    %c0_6 = arith.constant 0 : index
    %6 = vector.load %arg4[%c0_5, %c0_6] : memref<16x32xbf16, #tpu.memory_space<vmem>>, vector<16x32xbf16>
    %7 = arith.extf %6 : vector<16x32xbf16> to vector<16x32xf32>
    %8 = arith.addf %5, %7 : vector<16x32xf32>
    %cst_7 = arith.constant dense<0.000000e+00> : vector<16xf32>
    %9 = vector.multi_reduction <add>, %8, %cst_7 [1] : vector<16x32xf32> to vector<16xf32>
    %10 = vector.shape_cast %9 : vector<16xf32> to vector<16x1xf32>
    %cst_8 = arith.constant 3.200000e+01 : f32
    %11 = vector.broadcast %cst_8 : f32 to vector<16x1xf32>
    %12 = arith.divf %10, %11 : vector<16x1xf32>
    %13 = vector.broadcast %12 : vector<16x1xf32> to vector<16x32xf32>
    %14 = arith.subf %8, %13 : vector<16x32xf32>
    %15 = arith.mulf %14, %14 : vector<16x32xf32>
    %cst_9 = arith.constant dense<0.000000e+00> : vector<16xf32>
    %16 = vector.multi_reduction <add>, %15, %cst_9 [1] : vector<16x32xf32> to vector<16xf32>
    %17 = vector.shape_cast %16 : vector<16xf32> to vector<16x1xf32>
    %cst_10 = arith.constant 3.200000e+01 : f32
    %18 = vector.broadcast %cst_10 : f32 to vector<16x1xf32>
    %19 = arith.divf %17, %18 : vector<16x1xf32>
    %cst_11 = arith.constant 9.99999974E-6 : f32
    %20 = vector.broadcast %cst_11 : f32 to vector<16x1xf32>
    %21 = arith.addf %19, %20 : vector<16x1xf32>
    %22 = math.rsqrt %21 : vector<16x1xf32>
    %23 = vector.broadcast %22 : vector<16x1xf32> to vector<16x32xf32>
    %24 = arith.mulf %14, %23 : vector<16x32xf32>
    %c0_12 = arith.constant 0 : index
    %c0_13 = arith.constant 0 : index
    %25 = vector.load %arg5[%c0_12, %c0_13] : memref<1x32xf32, #tpu.memory_space<vmem>>, vector<1x32xf32>
    %26 = vector.broadcast %25 : vector<1x32xf32> to vector<16x32xf32>
    %27 = arith.mulf %24, %26 : vector<16x32xf32>
    %c0_14 = arith.constant 0 : index
    %c0_15 = arith.constant 0 : index
    %28 = vector.load %arg6[%c0_14, %c0_15] : memref<1x32xf32, #tpu.memory_space<vmem>>, vector<1x32xf32>
    %29 = vector.broadcast %28 : vector<1x32xf32> to vector<16x32xf32>
    %30 = arith.addf %27, %29 : vector<16x32xf32>
    %31 = arith.truncf %30 : vector<16x32xf32> to vector<16x32xbf16>
    %c0_16 = arith.constant 0 : index
    %c0_17 = arith.constant 0 : index
    %32 = vector.load %arg7[%c0_16, %c0_17] : memref<16x32xbf16, #tpu.memory_space<vmem>>, vector<16x32xbf16>
    tpu.vector_store %arg7[%c0_16, %c0_17], %31 {strides = array<i32>} : memref<16x32xbf16, #tpu.memory_space<vmem>>, vector<16x32xbf16>,
    return
  }
  func.func @transform_0(%arg0: i32) -> (i32, i32) {
    %c0_i32 = arith.constant 0 : i32
    %c0_i32_0 = arith.constant 0 : i32
    return %arg0, %c0_i32 : i32, i32
  }
  func.func @transform_1(%arg0: i32) -> (i32, i32) {
    %c0_i32 = arith.constant 0 : i32
    %c0_i32_0 = arith.constant 0 : i32
    %c0_i32_1 = arith.constant 0 : i32
    return %c0_i32, %c0_i32_0 : i32, i32
  }
  func.func @transform_2(%arg0: i32) -> (i32, i32) {
    %c0_i32 = arith.constant 0 : i32
    %c0_i32_0 = arith.constant 0 : i32
    %c0_i32_1 = arith.constant 0 : i32
    return %c0_i32, %c0_i32_0 : i32, i32
  }
  func.func @transform_3(%arg0: i32) -> (i32, i32) {
    %c0_i32 = arith.constant 0 : i32
    %c0_i32_0 = arith.constant 0 : i32
    return %arg0, %c0_i32 : i32, i32
  }
  func.func @transform_4(%arg0: i32) -> (i32, i32) {
    %c0_i32 = arith.constant 0 : i32
    %c0_i32_0 = arith.constant 0 : i32
    %c0_i32_1 = arith.constant 0 : i32
    return %c0_i32, %c0_i32_0 : i32, i32
  }
  func.func @transform_5(%arg0: i32) -> (i32, i32) {
    %c0_i32 = arith.constant 0 : i32
    %c0_i32_0 = arith.constant 0 : i32
    %c0_i32_1 = arith.constant 0 : i32
    return %c0_i32, %c0_i32_0 : i32, i32
  }
  func.func @transform_6(%arg0: i32) -> (i32, i32) {
    %c0_i32 = arith.constant 0 : i32
    %c0_i32_0 = arith.constant 0 : i32
    return %arg0, %c0_i32 : i32, i32
  }
}

module attributes {stable_mosaic.version = 11 : i64} {
  func.func @_matmul_kernel_1k(%arg0: i32, %arg1: i32, %arg2: memref<16x32xbf16, #tpu.memory_space<vmem>>, %arg3: memref<32x32xbf16, #tpu.memory_space<vmem>>, %arg4: memref<1x32xf32, #tpu.memory_space<vmem>>, %arg5: memref<16x32xbf16, #tpu.memory_space<vmem>>) attributes {dimension_semantics = [#tpu.dimension_semantics<parallel>, #tpu.dimension_semantics<parallel>], iteration_bounds = array<i64: 1, 1>, scalar_prefetch = 0 : i64, scratch_operands = 0 : i64, tpu.core_type = #tpu.core_type<tc>, window_params = [{transform_indices = @transform_0, window_bounds = array<i64: 16, 32>}, {transform_indices = @transform_1, window_bounds = array<i64: 32, 32>}, {transform_indices = @transform_2, window_bounds = array<i64: 1, 32>}, {transform_indices = @transform_3, window_bounds = array<i64: 16, 32>}]} {
    %c0 = arith.constant 0 : index
    %c0_0 = arith.constant 0 : index
    %0 = vector.load %arg2[%c0, %c0_0] : memref<16x32xbf16, #tpu.memory_space<vmem>>, vector<16x32xbf16>
    %c0_1 = arith.constant 0 : index
    %c0_2 = arith.constant 0 : index
    %1 = vector.load %arg3[%c0_1, %c0_2] : memref<32x32xbf16, #tpu.memory_space<vmem>>, vector<32x32xbf16>
    %cst = arith.constant dense<0.000000e+00> : vector<16x32xf32>
    %2 = tpu.matmul %0, %1, %cst {dimension_numbers = #tpu.dot_dimension_numbers<[1], [0], [0], [1], [0, 0, 1, 1], [], []>} : vector<16x32xbf16>, vector<32x32xbf16>, vector<16x32xf32> -> vector<16x32xf32>
    %c0_3 = arith.constant 0 : index
    %c0_4 = arith.constant 0 : index
    %3 = vector.load %arg4[%c0_3, %c0_4] : memref<1x32xf32, #tpu.memory_space<vmem>>, vector<1x32xf32>
    %4 = vector.broadcast %3 : vector<1x32xf32> to vector<16x32xf32>
    %5 = arith.addf %2, %4 : vector<16x32xf32>
    %6 = arith.truncf %5 : vector<16x32xf32> to vector<16x32xbf16>
    %c0_5 = arith.constant 0 : index
    %c0_6 = arith.constant 0 : index
    %7 = vector.load %arg5[%c0_5, %c0_6] : memref<16x32xbf16, #tpu.memory_space<vmem>>, vector<16x32xbf16>
    tpu.vector_store %arg5[%c0_5, %c0_6], %6 {strides = array<i32>} : memref<16x32xbf16, #tpu.memory_space<vmem>>, vector<16x32xbf16>,
    return
  }
  func.func @transform_0(%arg0: i32, %arg1: i32) -> (i32, i32) {
    %c0_i32 = arith.constant 0 : i32
    %c0_i32_0 = arith.constant 0 : i32
    return %arg1, %c0_i32 : i32, i32
  }
  func.func @transform_1(%arg0: i32, %arg1: i32) -> (i32, i32) {
    %c0_i32 = arith.constant 0 : i32
    %c0_i32_0 = arith.constant 0 : i32
    return %c0_i32, %arg0 : i32, i32
  }
  func.func @transform_2(%arg0: i32, %arg1: i32) -> (i32, i32) {
    %c0_i32 = arith.constant 0 : i32
    %c0_i32_0 = arith.constant 0 : i32
    return %c0_i32, %arg0 : i32, i32
  }
  func.func @transform_3(%arg0: i32, %arg1: i32) -> (i32, i32) {
    %c0_i32 = arith.constant 0 : i32
    return %arg1, %arg0 : i32, i32
  }
}

module attributes {stable_mosaic.version = 11 : i64} {
  func.func @_matmul_kernel_1k(%arg0: i32, %arg1: i32, %arg2: memref<16x32xbf16, #tpu.memory_space<vmem>>, %arg3: memref<32x64xbf16, #tpu.memory_space<vmem>>, %arg4: memref<1x64xf32, #tpu.memory_space<vmem>>, %arg5: memref<16x64xbf16, #tpu.memory_space<vmem>>) attributes {dimension_semantics = [#tpu.dimension_semantics<parallel>, #tpu.dimension_semantics<parallel>], iteration_bounds = array<i64: 1, 1>, scalar_prefetch = 0 : i64, scratch_operands = 0 : i64, tpu.core_type = #tpu.core_type<tc>, window_params = [{transform_indices = @transform_0, window_bounds = array<i64: 16, 32>}, {transform_indices = @transform_1, window_bounds = array<i64: 32, 64>}, {transform_indices = @transform_2, window_bounds = array<i64: 1, 64>}, {transform_indices = @transform_3, window_bounds = array<i64: 16, 64>}]} {
    %c0 = arith.constant 0 : index
    %c0_0 = arith.constant 0 : index
    %0 = vector.load %arg2[%c0, %c0_0] : memref<16x32xbf16, #tpu.memory_space<vmem>>, vector<16x32xbf16>
    %c0_1 = arith.constant 0 : index
    %c0_2 = arith.constant 0 : index
    %1 = vector.load %arg3[%c0_1, %c0_2] : memref<32x64xbf16, #tpu.memory_space<vmem>>, vector<32x64xbf16>
    %cst = arith.constant dense<0.000000e+00> : vector<16x64xf32>
    %2 = tpu.matmul %0, %1, %cst {dimension_numbers = #tpu.dot_dimension_numbers<[1], [0], [0], [1], [0, 0, 1, 1], [], []>} : vector<16x32xbf16>, vector<32x64xbf16>, vector<16x64xf32> -> vector<16x64xf32>
    %c0_3 = arith.constant 0 : index
    %c0_4 = arith.constant 0 : index
    %3 = vector.load %arg4[%c0_3, %c0_4] : memref<1x64xf32, #tpu.memory_space<vmem>>, vector<1x64xf32>
    %4 = vector.broadcast %3 : vector<1x64xf32> to vector<16x64xf32>
    %5 = arith.addf %2, %4 : vector<16x64xf32>
    %6 = arith.truncf %5 : vector<16x64xf32> to vector<16x64xbf16>
    %c0_5 = arith.constant 0 : index
    %c0_6 = arith.constant 0 : index
    %7 = vector.load %arg5[%c0_5, %c0_6] : memref<16x64xbf16, #tpu.memory_space<vmem>>, vector<16x64xbf16>
    tpu.vector_store %arg5[%c0_5, %c0_6], %6 {strides = array<i32>} : memref<16x64xbf16, #tpu.memory_space<vmem>>, vector<16x64xbf16>,
    return
  }
  func.func @transform_0(%arg0: i32, %arg1: i32) -> (i32, i32) {
    %c0_i32 = arith.constant 0 : i32
    %c0_i32_0 = arith.constant 0 : i32
    return %arg1, %c0_i32 : i32, i32
  }
  func.func @transform_1(%arg0: i32, %arg1: i32) -> (i32, i32) {
    %c0_i32 = arith.constant 0 : i32
    %c0_i32_0 = arith.constant 0 : i32
    return %c0_i32, %arg0 : i32, i32
  }
  func.func @transform_2(%arg0: i32, %arg1: i32) -> (i32, i32) {
    %c0_i32 = arith.constant 0 : i32
    %c0_i32_0 = arith.constant 0 : i32
    return %c0_i32, %arg0 : i32, i32
  }
  func.func @transform_3(%arg0: i32, %arg1: i32) -> (i32, i32) {
    %c0_i32 = arith.constant 0 : i32
    return %arg1, %arg0 : i32, i32
  }
}

module attributes {stable_mosaic.version = 11 : i64} {
  func.func @_matmul_kernel_1k(%arg0: i32, %arg1: i32, %arg2: memref<16x32xbf16, #tpu.memory_space<vmem>>, %arg3: memref<32x512xbf16, #tpu.memory_space<vmem>>, %arg4: memref<1x512xf32, #tpu.memory_space<vmem>>, %arg5: memref<16x512xbf16, #tpu.memory_space<vmem>>) attributes {dimension_semantics = [#tpu.dimension_semantics<parallel>, #tpu.dimension_semantics<parallel>], iteration_bounds = array<i64: 4, 1>, scalar_prefetch = 0 : i64, scratch_operands = 0 : i64, tpu.core_type = #tpu.core_type<tc>, window_params = [{transform_indices = @transform_0, window_bounds = array<i64: 16, 32>}, {transform_indices = @transform_1, window_bounds = array<i64: 32, 512>}, {transform_indices = @transform_2, window_bounds = array<i64: 1, 512>}, {transform_indices = @transform_3, window_bounds = array<i64: 16, 512>}]} {
    %c0 = arith.constant 0 : index
    %c0_0 = arith.constant 0 : index
    %0 = vector.load %arg2[%c0, %c0_0] : memref<16x32xbf16, #tpu.memory_space<vmem>>, vector<16x32xbf16>
    %c0_1 = arith.constant 0 : index
    %c0_2 = arith.constant 0 : index
    %1 = vector.load %arg3[%c0_1, %c0_2] : memref<32x512xbf16, #tpu.memory_space<vmem>>, vector<32x512xbf16>
    %cst = arith.constant dense<0.000000e+00> : vector<16x512xf32>
    %2 = tpu.matmul %0, %1, %cst {dimension_numbers = #tpu.dot_dimension_numbers<[1], [0], [0], [1], [0, 0, 1, 1], [], []>} : vector<16x32xbf16>, vector<32x512xbf16>, vector<16x512xf32> -> vector<16x512xf32>
    %c0_3 = arith.constant 0 : index
    %c0_4 = arith.constant 0 : index
    %3 = vector.load %arg4[%c0_3, %c0_4] : memref<1x512xf32, #tpu.memory_space<vmem>>, vector<1x512xf32>
    %4 = vector.broadcast %3 : vector<1x512xf32> to vector<16x512xf32>
    %5 = arith.addf %2, %4 : vector<16x512xf32>
    %cst_5 = arith.constant 0.000000e+00 : f32
    %6 = vector.broadcast %cst_5 : f32 to vector<16x512xf32>
    %7 = arith.maximumf %5, %6 : vector<16x512xf32>
    %8 = arith.truncf %7 : vector<16x512xf32> to vector<16x512xbf16>
    %c0_6 = arith.constant 0 : index
    %c0_7 = arith.constant 0 : index
    %9 = vector.load %arg5[%c0_6, %c0_7] : memref<16x512xbf16, #tpu.memory_space<vmem>>, vector<16x512xbf16>
    tpu.vector_store %arg5[%c0_6, %c0_7], %8 {strides = array<i32>} : memref<16x512xbf16, #tpu.memory_space<vmem>>, vector<16x512xbf16>,
    return
  }
  func.func @transform_0(%arg0: i32, %arg1: i32) -> (i32, i32) {
    %c0_i32 = arith.constant 0 : i32
    %c0_i32_0 = arith.constant 0 : i32
    return %arg1, %c0_i32 : i32, i32
  }
  func.func @transform_1(%arg0: i32, %arg1: i32) -> (i32, i32) {
    %c0_i32 = arith.constant 0 : i32
    %c0_i32_0 = arith.constant 0 : i32
    return %c0_i32, %arg0 : i32, i32
  }
  func.func @transform_2(%arg0: i32, %arg1: i32) -> (i32, i32) {
    %c0_i32 = arith.constant 0 : i32
    %c0_i32_0 = arith.constant 0 : i32
    return %c0_i32, %arg0 : i32, i32
  }
  func.func @transform_3(%arg0: i32, %arg1: i32) -> (i32, i32) {
    %c0_i32 = arith.constant 0 : i32
    return %arg1, %arg0 : i32, i32
  }
}

module attributes {stable_mosaic.version = 11 : i64} {
  func.func @_cross_attn_kernel(%arg0: i32, %arg1: i32, %arg2: i32, %arg3: memref<1x1x8x8xbf16, #tpu.memory_space<vmem>>, %arg4: memref<1x1x8x8xbf16, #tpu.memory_space<vmem>>, %arg5: memref<1x1x8x8xbf16, #tpu.memory_space<vmem>>, %arg6: memref<1x1x8x8xbf16, #tpu.memory_space<vmem>>) attributes {dimension_semantics = [#tpu.dimension_semantics<parallel>, #tpu.dimension_semantics<parallel>, #tpu.dimension_semantics<parallel>], iteration_bounds = array<i64: 2, 4, 1>, scalar_prefetch = 0 : i64, scratch_operands = 0 : i64, tpu.core_type = #tpu.core_type<tc>, window_params = [{transform_indices = @transform_0, window_bounds = array<i64: 1, 1, 8, 8>}, {transform_indices = @transform_1, window_bounds = array<i64: 1, 1, 8, 8>}, {transform_indices = @transform_2, window_bounds = array<i64: 1, 1, 8, 8>}, {transform_indices = @transform_3, window_bounds = array<i64: 1, 1, 8, 8>}]} {
    %c0 = arith.constant 0 : index
    %c0_0 = arith.constant 0 : index
    %c0_1 = arith.constant 0 : index
    %c0_2 = arith.constant 0 : index
    %0 = vector.load %arg3[%c0, %c0_0, %c0_1, %c0_2] : memref<1x1x8x8xbf16, #tpu.memory_space<vmem>>, vector<1x1x8x8xbf16>
    %1 = vector.shape_cast %0 : vector<1x1x8x8xbf16> to vector<8x8xbf16>
    %c0_3 = arith.constant 0 : index
    %c0_4 = arith.constant 0 : index
    %c0_5 = arith.constant 0 : index
    %c0_6 = arith.constant 0 : index
    %2 = vector.load %arg4[%c0_3, %c0_4, %c0_5, %c0_6] : memref<1x1x8x8xbf16, #tpu.memory_space<vmem>>, vector<1x1x8x8xbf16>
    %3 = vector.shape_cast %2 : vector<1x1x8x8xbf16> to vector<8x8xbf16>
    %c0_7 = arith.constant 0 : index
    %c0_8 = arith.constant 0 : index
    %c0_9 = arith.constant 0 : index
    %c0_10 = arith.constant 0 : index
    %4 = vector.load %arg5[%c0_7, %c0_8, %c0_9, %c0_10] : memref<1x1x8x8xbf16, #tpu.memory_space<vmem>>, vector<1x1x8x8xbf16>
    %5 = vector.shape_cast %4 : vector<1x1x8x8xbf16> to vector<8x8xbf16>
    %cst = arith.constant dense<0.000000e+00> : vector<8x8xf32>
    %6 = tpu.matmul %1, %3, %cst {dimension_numbers = #tpu.dot_dimension_numbers<[1], [1], [0], [0], [0, 0, 1, 0], [], []>} : vector<8x8xbf16>, vector<8x8xbf16>, vector<8x8xf32> -> vector<8x8xf32>
    %cst_11 = arith.constant 0.353553385 : f32
    %7 = vector.broadcast %cst_11 : f32 to vector<8x8xf32>
    %8 = arith.mulf %6, %7 : vector<8x8xf32>
    %cst_12 = arith.constant dense<0xFF800000> : vector<8xf32>
    %9 = vector.multi_reduction <maximumf>, %8, %cst_12 [1] : vector<8x8xf32> to vector<8xf32>
    %10 = vector.shape_cast %9 : vector<8xf32> to vector<8x1xf32>
    %cst_13 = arith.constant -1.000000e+30 : f32
    %11 = vector.broadcast %cst_13 : f32 to vector<8x1xf32>
    %12 = arith.maximumf %10, %11 : vector<8x1xf32>
    %13 = vector.broadcast %12 : vector<8x1xf32> to vector<8x8xf32>
    %14 = arith.subf %8, %13 : vector<8x8xf32>
    %15 = math.exp %14 : vector<8x8xf32>
    %cst_14 = arith.constant dense<0.000000e+00> : vector<8xf32>
    %16 = vector.multi_reduction <add>, %15, %cst_14 [1] : vector<8x8xf32> to vector<8xf32>
    %17 = vector.shape_cast %16 : vector<8xf32> to vector<8x1xf32>
    %cst_15 = arith.constant 1.000000e-30 : f32
    %18 = vector.broadcast %cst_15 : f32 to vector<8x1xf32>
    %19 = arith.maximumf %17, %18 : vector<8x1xf32>
    %20 = tpu.reciprocal %19 {approx = true} : vector<8x1xf32> -> vector<8x1xf32>
    %21 = vector.broadcast %20 : vector<8x1xf32> to vector<8x8xf32>
    %22 = arith.mulf %15, %21 : vector<8x8xf32>
    %23 = arith.truncf %22 : vector<8x8xf32> to vector<8x8xbf16>
    %cst_16 = arith.constant dense<0.000000e+00> : vector<8x8xf32>
    %24 = tpu.matmul %23, %5, %cst_16 {dimension_numbers = #tpu.dot_dimension_numbers<[1], [0], [0], [1], [0, 0, 1, 1], [], []>} : vector<8x8xbf16>, vector<8x8xbf16>, vector<8x8xf32> -> vector<8x8xf32>
    %25 = arith.truncf %24 : vector<8x8xf32> to vector<8x8xbf16>
    %c0_17 = arith.constant 0 : index
    %c0_18 = arith.constant 0 : index
    %c0_19 = arith.constant 0 : index
    %c0_20 = arith.constant 0 : index
    %26 = vector.load %arg6[%c0_17, %c0_18, %c0_19, %c0_20] : memref<1x1x8x8xbf16, #tpu.memory_space<vmem>>, vector<1x1x8x8xbf16>
    %27 = vector.shape_cast %26 : vector<1x1x8x8xbf16> to vector<8x8xbf16>
    %28 = vector.shape_cast %25 : vector<8x8xbf16> to vector<1x1x8x8xbf16>
    tpu.vector_store %arg6[%c0_17, %c0_18, %c0_19, %c0_20], %28 {strides = array<i32>} : memref<1x1x8x8xbf16, #tpu.memory_space<vmem>>, vector<1x1x8x8xbf16>,
    return
  }
  func.func @transform_0(%arg0: i32, %arg1: i32, %arg2: i32) -> (i32, i32, i32, i32) {
    %c0_i32 = arith.constant 0 : i32
    %c0_i32_0 = arith.constant 0 : i32
    return %arg0, %arg1, %arg2, %c0_i32 : i32, i32, i32, i32
  }
  func.func @transform_1(%arg0: i32, %arg1: i32, %arg2: i32) -> (i32, i32, i32, i32) {
    %c0_i32 = arith.constant 0 : i32
    %c0_i32_0 = arith.constant 0 : i32
    %c0_i32_1 = arith.constant 0 : i32
    return %arg0, %arg1, %c0_i32, %c0_i32_0 : i32, i32, i32, i32
  }
  func.func @transform_2(%arg0: i32, %arg1: i32, %arg2: i32) -> (i32, i32, i32, i32) {
    %c0_i32 = arith.constant 0 : i32
    %c0_i32_0 = arith.constant 0 : i32
    %c0_i32_1 = arith.constant 0 : i32
    return %arg0, %arg1, %c0_i32, %c0_i32_0 : i32, i32, i32, i32
  }
  func.func @transform_3(%arg0: i32, %arg1: i32, %arg2: i32) -> (i32, i32, i32, i32) {
    %c0_i32 = arith.constant 0 : i32
    %c0_i32_0 = arith.constant 0 : i32
    return %arg0, %arg1, %arg2, %c0_i32 : i32, i32, i32, i32
  }
}

module attributes {stable_mosaic.version = 11 : i64} {
  func.func @_matmul_ln_kernel_acc(%arg0: i32, %arg1: i32, %arg2: memref<16x512xbf16, #tpu.memory_space<vmem>>, %arg3: memref<512x32xbf16, #tpu.memory_space<vmem>>, %arg4: memref<1x32xf32, #tpu.memory_space<vmem>>, %arg5: memref<16x32xbf16, #tpu.memory_space<vmem>>, %arg6: memref<1x32xf32, #tpu.memory_space<vmem>>, %arg7: memref<1x32xf32, #tpu.memory_space<vmem>>, %arg8: memref<16x32xbf16, #tpu.memory_space<vmem>>, %arg9: memref<16x32xf32, #tpu.memory_space<vmem>>) attributes {dimension_semantics = [#tpu.dimension_semantics<parallel>, #tpu.dimension_semantics<arbitrary>], iteration_bounds = array<i64: 1, 4>, scalar_prefetch = 0 : i64, scratch_operands = 1 : i64, tpu.core_type = #tpu.core_type<tc>, window_params = [{transform_indices = @transform_0, window_bounds = array<i64: 16, 512>}, {transform_indices = @transform_1, window_bounds = array<i64: 512, 32>}, {pipeline_mode = #tpu.pipeline_mode<synchronous>, transform_indices = @transform_2, window_bounds = array<i64: 1, 32>}, {transform_indices = @transform_3, window_bounds = array<i64: 16, 32>}, {pipeline_mode = #tpu.pipeline_mode<synchronous>, transform_indices = @transform_4, window_bounds = array<i64: 1, 32>}, {pipeline_mode = #tpu.pipeline_mode<synchronous>, transform_indices = @transform_5, window_bounds = array<i64: 1, 32>}, {transform_indices = @transform_6, window_bounds = array<i64: 16, 32>}]} {
    %c0_i32 = arith.constant 0 : i32
    %0 = arith.cmpi eq, %arg1, %c0_i32 : i32
    %1 = arith.extui %0 : i1 to i32
    %c0_i32_0 = arith.constant 0 : i32
    %2 = arith.cmpi ne, %1, %c0_i32_0 : i32
    scf.if %2 {
      %cst_9 = arith.constant 0.000000e+00 : f32
      %12 = vector.broadcast %cst_9 : f32 to vector<16x32xf32>
      %c0_10 = arith.constant 0 : index
      %c0_11 = arith.constant 0 : index
      %13 = vector.load %arg9[%c0_10, %c0_11] : memref<16x32xf32, #tpu.memory_space<vmem>>, vector<16x32xf32>
      tpu.vector_store %arg9[%c0_10, %c0_11], %12 {strides = array<i32>} : memref<16x32xf32, #tpu.memory_space<vmem>>, vector<16x32xf32>,
    } else {
    }
    %c0 = arith.constant 0 : index
    %c0_1 = arith.constant 0 : index
    %3 = vector.load %arg9[%c0, %c0_1] : memref<16x32xf32, #tpu.memory_space<vmem>>, vector<16x32xf32>
    %c0_2 = arith.constant 0 : index
    %c0_3 = arith.constant 0 : index
    %4 = vector.load %arg2[%c0_2, %c0_3] : memref<16x512xbf16, #tpu.memory_space<vmem>>, vector<16x512xbf16>
    %c0_4 = arith.constant 0 : index
    %c0_5 = arith.constant 0 : index
    %5 = vector.load %arg3[%c0_4, %c0_5] : memref<512x32xbf16, #tpu.memory_space<vmem>>, vector<512x32xbf16>
    %cst = arith.constant dense<0.000000e+00> : vector<16x32xf32>
    %6 = tpu.matmul %4, %5, %cst {dimension_numbers = #tpu.dot_dimension_numbers<[1], [0], [0], [1], [0, 0, 1, 1], [], []>} : vector<16x512xbf16>, vector<512x32xbf16>, vector<16x32xf32> -> vector<16x32xf32>
    %7 = arith.addf %3, %6 : vector<16x32xf32>
    %c0_6 = arith.constant 0 : index
    %c0_7 = arith.constant 0 : index
    %8 = vector.load %arg9[%c0_6, %c0_7] : memref<16x32xf32, #tpu.memory_space<vmem>>, vector<16x32xf32>
    tpu.vector_store %arg9[%c0_6, %c0_7], %7 {strides = array<i32>} : memref<16x32xf32, #tpu.memory_space<vmem>>, vector<16x32xf32>,
    %c3_i32 = arith.constant 3 : i32
    %9 = arith.cmpi eq, %arg1, %c3_i32 : i32
    %10 = arith.extui %9 : i1 to i32
    %c0_i32_8 = arith.constant 0 : i32
    %11 = arith.cmpi ne, %10, %c0_i32_8 : i32
    scf.if %11 {
      %c0_9 = arith.constant 0 : index
      %c0_10 = arith.constant 0 : index
      %12 = vector.load %arg9[%c0_9, %c0_10] : memref<16x32xf32, #tpu.memory_space<vmem>>, vector<16x32xf32>
      %c0_11 = arith.constant 0 : index
      %c0_12 = arith.constant 0 : index
      %13 = vector.load %arg4[%c0_11, %c0_12] : memref<1x32xf32, #tpu.memory_space<vmem>>, vector<1x32xf32>
      %14 = vector.broadcast %13 : vector<1x32xf32> to vector<16x32xf32>
      %15 = arith.addf %12, %14 : vector<16x32xf32>
      %c0_13 = arith.constant 0 : index
      %c0_14 = arith.constant 0 : index
      %16 = vector.load %arg5[%c0_13, %c0_14] : memref<16x32xbf16, #tpu.memory_space<vmem>>, vector<16x32xbf16>
      %17 = arith.extf %16 : vector<16x32xbf16> to vector<16x32xf32>
      %18 = arith.addf %15, %17 : vector<16x32xf32>
      %cst_15 = arith.constant dense<0.000000e+00> : vector<16xf32>
      %19 = vector.multi_reduction <add>, %18, %cst_15 [1] : vector<16x32xf32> to vector<16xf32>
      %20 = vector.shape_cast %19 : vector<16xf32> to vector<16x1xf32>
      %cst_16 = arith.constant 3.200000e+01 : f32
      %21 = vector.broadcast %cst_16 : f32 to vector<16x1xf32>
      %22 = arith.divf %20, %21 : vector<16x1xf32>
      %23 = vector.broadcast %22 : vector<16x1xf32> to vector<16x32xf32>
      %24 = arith.subf %18, %23 : vector<16x32xf32>
      %25 = arith.mulf %24, %24 : vector<16x32xf32>
      %cst_17 = arith.constant dense<0.000000e+00> : vector<16xf32>
      %26 = vector.multi_reduction <add>, %25, %cst_17 [1] : vector<16x32xf32> to vector<16xf32>
      %27 = vector.shape_cast %26 : vector<16xf32> to vector<16x1xf32>
      %cst_18 = arith.constant 3.200000e+01 : f32
      %28 = vector.broadcast %cst_18 : f32 to vector<16x1xf32>
      %29 = arith.divf %27, %28 : vector<16x1xf32>
      %cst_19 = arith.constant 9.99999974E-6 : f32
      %30 = vector.broadcast %cst_19 : f32 to vector<16x1xf32>
      %31 = arith.addf %29, %30 : vector<16x1xf32>
      %32 = math.rsqrt %31 : vector<16x1xf32>
      %33 = vector.broadcast %32 : vector<16x1xf32> to vector<16x32xf32>
      %34 = arith.mulf %24, %33 : vector<16x32xf32>
      %c0_20 = arith.constant 0 : index
      %c0_21 = arith.constant 0 : index
      %35 = vector.load %arg6[%c0_20, %c0_21] : memref<1x32xf32, #tpu.memory_space<vmem>>, vector<1x32xf32>
      %36 = vector.broadcast %35 : vector<1x32xf32> to vector<16x32xf32>
      %37 = arith.mulf %34, %36 : vector<16x32xf32>
      %c0_22 = arith.constant 0 : index
      %c0_23 = arith.constant 0 : index
      %38 = vector.load %arg7[%c0_22, %c0_23] : memref<1x32xf32, #tpu.memory_space<vmem>>, vector<1x32xf32>
      %39 = vector.broadcast %38 : vector<1x32xf32> to vector<16x32xf32>
      %40 = arith.addf %37, %39 : vector<16x32xf32>
      %41 = arith.truncf %40 : vector<16x32xf32> to vector<16x32xbf16>
      %c0_24 = arith.constant 0 : index
      %c0_25 = arith.constant 0 : index
      %42 = vector.load %arg8[%c0_24, %c0_25] : memref<16x32xbf16, #tpu.memory_space<vmem>>, vector<16x32xbf16>
      tpu.vector_store %arg8[%c0_24, %c0_25], %41 {strides = array<i32>} : memref<16x32xbf16, #tpu.memory_space<vmem>>, vector<16x32xbf16>,
    } else {
    }
    return
  }
  func.func @transform_0(%arg0: i32, %arg1: i32) -> (i32, i32) {
    %c0_i32 = arith.constant 0 : i32
    return %arg0, %arg1 : i32, i32
  }
  func.func @transform_1(%arg0: i32, %arg1: i32) -> (i32, i32) {
    %c0_i32 = arith.constant 0 : i32
    %c0_i32_0 = arith.constant 0 : i32
    return %arg1, %c0_i32 : i32, i32
  }
  func.func @transform_2(%arg0: i32, %arg1: i32) -> (i32, i32) {
    %c0_i32 = arith.constant 0 : i32
    %c0_i32_0 = arith.constant 0 : i32
    %c0_i32_1 = arith.constant 0 : i32
    return %c0_i32, %c0_i32_0 : i32, i32
  }
  func.func @transform_3(%arg0: i32, %arg1: i32) -> (i32, i32) {
    %c0_i32 = arith.constant 0 : i32
    %c0_i32_0 = arith.constant 0 : i32
    return %arg0, %c0_i32 : i32, i32
  }
  func.func @transform_4(%arg0: i32, %arg1: i32) -> (i32, i32) {
    %c0_i32 = arith.constant 0 : i32
    %c0_i32_0 = arith.constant 0 : i32
    %c0_i32_1 = arith.constant 0 : i32
    return %c0_i32, %c0_i32_0 : i32, i32
  }
  func.func @transform_5(%arg0: i32, %arg1: i32) -> (i32, i32) {
    %c0_i32 = arith.constant 0 : i32
    %c0_i32_0 = arith.constant 0 : i32
    %c0_i32_1 = arith.constant 0 : i32
    return %c0_i32, %c0_i32_0 : i32, i32
  }
  func.func @transform_6(%arg0: i32, %arg1: i32) -> (i32, i32) {
    %c0_i32 = arith.constant 0 : i32
    %c0_i32_0 = arith.constant 0 : i32
    return %arg0, %c0_i32 : i32, i32
  }
}

module attributes {stable_mosaic.version = 11 : i64} {
  func.func @_proj_softmax_kernel(%arg0: i32, %arg1: i32, %arg2: memref<1x8x32xbf16, #tpu.memory_space<vmem>>, %arg3: memref<16x32xbf16, #tpu.memory_space<vmem>>, %arg4: memref<16x1xf32, #tpu.memory_space<vmem>>, %arg5: memref<1x16x8xf32, #tpu.memory_space<vmem>>) attributes {dimension_semantics = [#tpu.dimension_semantics<parallel>, #tpu.dimension_semantics<parallel>], iteration_bounds = array<i64: 2, 1>, scalar_prefetch = 0 : i64, scratch_operands = 0 : i64, tpu.core_type = #tpu.core_type<tc>, window_params = [{transform_indices = @transform_0, window_bounds = array<i64: 1, 8, 32>}, {pipeline_mode = #tpu.pipeline_mode<synchronous>, transform_indices = @transform_1, window_bounds = array<i64: 16, 32>}, {pipeline_mode = #tpu.pipeline_mode<synchronous>, transform_indices = @transform_2, window_bounds = array<i64: 16, 1>}, {transform_indices = @transform_3, window_bounds = array<i64: 1, 16, 8>}]} {
    %c0 = arith.constant 0 : index
    %c0_0 = arith.constant 0 : index
    %0 = vector.load %arg3[%c0, %c0_0] : memref<16x32xbf16, #tpu.memory_space<vmem>>, vector<16x32xbf16>
    %c0_1 = arith.constant 0 : index
    %c0_2 = arith.constant 0 : index
    %c0_3 = arith.constant 0 : index
    %1 = vector.load %arg2[%c0_1, %c0_2, %c0_3] : memref<1x8x32xbf16, #tpu.memory_space<vmem>>, vector<1x8x32xbf16>
    %2 = vector.shape_cast %1 : vector<1x8x32xbf16> to vector<8x32xbf16>
    %cst = arith.constant dense<0.000000e+00> : vector<16x8xf32>
    %3 = tpu.matmul %0, %2, %cst {dimension_numbers = #tpu.dot_dimension_numbers<[1], [1], [0], [0], [0, 0, 1, 0], [], []>} : vector<16x32xbf16>, vector<8x32xbf16>, vector<16x8xf32> -> vector<16x8xf32>
    %c0_4 = arith.constant 0 : index
    %c0_5 = arith.constant 0 : index
    %4 = vector.load %arg4[%c0_4, %c0_5] : memref<16x1xf32, #tpu.memory_space<vmem>>, vector<16x1xf32>
    %5 = vector.broadcast %4 : vector<16x1xf32> to vector<16x8xf32>
    %6 = arith.addf %3, %5 : vector<16x8xf32>
    %cst_6 = arith.constant dense<0xFF800000> : vector<8xf32>
    %7 = vector.multi_reduction <maximumf>, %6, %cst_6 [0] : vector<16x8xf32> to vector<8xf32>
    %8 = vector.shape_cast %7 : vector<8xf32> to vector<1x8xf32>
    %9 = vector.broadcast %8 : vector<1x8xf32> to vector<16x8xf32>
    %10 = arith.subf %6, %9 : vector<16x8xf32>
    %11 = math.exp %10 : vector<16x8xf32>
    %cst_7 = arith.constant dense<0.000000e+00> : vector<8xf32>
    %12 = vector.multi_reduction <add>, %11, %cst_7 [0] : vector<16x8xf32> to vector<8xf32>
    %13 = vector.shape_cast %12 : vector<8xf32> to vector<1x8xf32>
    %14 = vector.broadcast %13 : vector<1x8xf32> to vector<16x8xf32>
    %15 = arith.divf %11, %14 : vector<16x8xf32>
    %c0_8 = arith.constant 0 : index
    %c0_9 = arith.constant 0 : index
    %c0_10 = arith.constant 0 : index
    %16 = vector.load %arg5[%c0_8, %c0_9, %c0_10] : memref<1x16x8xf32, #tpu.memory_space<vmem>>, vector<1x16x8xf32>
    %17 = vector.shape_cast %16 : vector<1x16x8xf32> to vector<16x8xf32>
    %18 = vector.shape_cast %15 : vector<16x8xf32> to vector<1x16x8xf32>
    tpu.vector_store %arg5[%c0_8, %c0_9, %c0_10], %18 {strides = array<i32>} : memref<1x16x8xf32, #tpu.memory_space<vmem>>, vector<1x16x8xf32>,
    return
  }
  func.func @transform_0(%arg0: i32, %arg1: i32) -> (i32, i32, i32) {
    %c0_i32 = arith.constant 0 : i32
    %c0_i32_0 = arith.constant 0 : i32
    return %arg0, %arg1, %c0_i32 : i32, i32, i32
  }
  func.func @transform_1(%arg0: i32, %arg1: i32) -> (i32, i32) {
    %c0_i32 = arith.constant 0 : i32
    %c0_i32_0 = arith.constant 0 : i32
    %c0_i32_1 = arith.constant 0 : i32
    return %c0_i32, %c0_i32_0 : i32, i32
  }
  func.func @transform_2(%arg0: i32, %arg1: i32) -> (i32, i32) {
    %c0_i32 = arith.constant 0 : i32
    %c0_i32_0 = arith.constant 0 : i32
    %c0_i32_1 = arith.constant 0 : i32
    return %c0_i32, %c0_i32_0 : i32, i32
  }
  func.func @transform_3(%arg0: i32, %arg1: i32) -> (i32, i32, i32) {
    %c0_i32 = arith.constant 0 : i32
    %c0_i32_0 = arith.constant 0 : i32
    return %arg0, %c0_i32, %arg1 : i32, i32, i32
  }
}

</mosaic_0001>

<bundles_post_ra>
// kernel: feature_transformer_forward.20
= control target key start
LH: loop header
LB: loop body
LE: loop exit
PB: predicated region body
PF: predicated region fallthrough
CT: control target
= control target key end

     0   :  { %s560_s6 = smov 0   ;;  %s640_s0 = inlined_call_operand.vmem [shape: f32[2,8,32], index: 0, kind: input, shape index: {}]   ;;  %s641_s1 = inlined_call_operand.vmem [shape: bf16[2,8,32], index: 1, kind: output, shape index: {}]  }
   0x1 LB: > { %s566_s7 = sadd.s32 4294967295, %s541_s6   ;;  %p507_p0 = scmp.ge.s32.totalorder %s541_s6, 1  ;;  %s541_s6 = sphi %s560_s6, %s11_s6  }
   0x2   : > { %p86_p1 = scmp.lt.s32.totalorder %s541_s6, 3 }
   0x4   : > { %p87_p2 = pnand %p507_p0, %p86_p1 }
   0x5   : > { %s112_s8 = scvt.s32.f32 (!%p87_p2), %s566_s7  ;;  %p104_p3 = scmp.lt.s32.totalorder (!%p87_p2), %s566_s7, 1 }
   0x6   : > { %90 = sbr.rel (%p87_p2) target bundleno = 136 (0x88), region = 24 }
   0xb   : > { %v113_v0 = vlaneseq  ;;  %v132_v7 = vstv %s112_s8  ;;  %v543_v21 = vmov 683565275   ;;  %v544_v23 = vmov 2475754826   ;;  %s643_s7 = smov (!%p104_p3, %s566_s7), 1 }
   0xc   : > { %v545_v25 = vmov 2131351028   ;;  %v546_v27 = vmov 2102212464   ;;  %v547_v29 = vmov 920167782  }
   0xd   : > { %v570_v1 = vand.u32 127, %v113_v0  ;;  %v548_v35 = vmov 1326507024   ;;  %s508_s9 = sshll.u32 %s643_s7, 3  ;;  %s509_s13 = sshll.u32 %s643_s7, 2 }
   0xe   : > { %s107_s12 = scalar_lea.vmem %s640_s0, %s508_s9  ;;  %s111_s16 = scalar_lea.vmem %s641_s1, %s509_s13 }
   0xf   : > { %v119_v2 = vand.u32 1, %v570_v1 }
  0x11   : > { %v127_v3 = vsub.s32 %v570_v1, %v119_v2 }
  0x13   : > { %v128_v4 = vcvt.s32.f32 %v127_v3 }
  0x15   : > { %v129_v5 = vmul.f32 -0.28782314, %v128_v4 }
  0x17   : > { %v130_v6 = vmul.f32 1.442695, %v129_v5 }
  0x19   : > { %533 = vpow2.f32 %v130_v6 }
  0x1f   : > { %v534_v8 = vpop.eup %533 }
  0x20   : > { %v577_v9 = vmul.f32 %v534_v8, %v132_v7 }
  0x22   : > { %v138_v10 = vand.u32 2139095040, %v577_v9  ;;  %v135_v12 = vand.u32 2147483647, %v577_v9  ;;  %vm137_vm12 = vcmp.lt.s32.totalorder %v577_v9, 0 }
  0x24   : > { %v139_v11 = vshrl.u32 %v138_v10, 23  ;;  %v142_v15 = vand.u32 8388607, %v135_v12  ;;  %vm136_vm13 = vcmp.le.f32.partialorder %v135_v12, 0.7853982 }
  0x26   : > { %v510_v13 = vadd.s32 4294967169, %v139_v11  ;;  %v143_v18 = vor.u32 8388608, %v142_v15 }
  0x28   : > { %v145_v14 = vadd.s32 1, %v510_v13  ;;  %v586_v37 = vshll.u32 %v143_v18, 8  ;;  %v549_v13 = vmov 0  }
  0x2a   : > { %vm146_vm0 = vcmp.gt.s32.totalorder %v145_v14, 0  ;;  %v184_v49 = vand.u32 65535, %v586_v37  ;;  %v185_v50 = vshrl.u32 %v586_v37, 16 }
  0x2b   : > { %v147_v16 = vsel %vm146_vm0, %v145_v14, 0 }
  0x2c   : > { %v149_v17 = vand.u32 31, %v147_v16  ;;  %v583_v19 = vshrl.u32 %v147_v16, 5 }
  0x2e   : > { %v150_v20 = vsub.s32 32, %v149_v17  ;;  %v152_v22 = vshll.u32 %v543_v21, %v149_v17  ;;  %v155_v24 = vshll.u32 %v544_v23, %v149_v17  ;;  %v158_v26 = vshll.u32 %v545_v25, %v149_v17 }
  0x2f   : > { %v161_v28 = vshll.u32 %v546_v27, %v149_v17  ;;  %v164_v30 = vshll.u32 %v547_v29, %v149_v17  ;;  %vm167_vm1 = vcmp.lt.s32.totalorder %v583_v19, 1  ;;  %vm170_vm2 = vcmp.lt.s32.totalorder %v583_v19, 4 }
  0x30   : > { %v153_v31 = vshrl.u32 %v544_v23, %v150_v20  ;;  %v156_v32 = vshrl.u32 %v545_v25, %v150_v20  ;;  %v159_v33 = vshrl.u32 %v546_v27, %v150_v20  ;;  %v162_v34 = vshrl.u32 %v547_v29, %v150_v20 }
  0x31   : > { %v165_v36 = vshrl.u32 %v548_v35, %v150_v20  ;;  %vm169_vm3 = vcmp.lt.s32.totalorder %v583_v19, 3  ;;  %vm168_vm4 = vcmp.lt.s32.totalorder %v583_v19, 2  ;;  %v151_v57 = vshrl.u32 %v543_v21, %v150_v20 }
  0x32   : > { %v154_v38 = vor.u32 %v153_v31, %v152_v22  ;;  %v157_v39 = vor.u32 %v156_v32, %v155_v24  ;;  %v160_v40 = vor.u32 %v159_v33, %v158_v26  ;;  %v163_v41 = vor.u32 %v162_v34, %v161_v28 }
  0x33   : > { %v166_v42 = vor.u32 %v165_v36, %v164_v30 }
  0x34   : > { %v175_v43 = vsel %vm167_vm1, %v154_v38, %v157_v39  ;;  %v179_v44 = vsel %vm167_vm1, %v157_v39, %v160_v40  ;;  %v176_v45 = vsel %vm170_vm2, %v163_v41, 920167782  ;;  %v171_v8 = vsel %vm167_vm1, %v151_v57, %v154_v38 }
  0x35   : > { %v180_v46 = vsel %vm170_vm2, %v166_v42, 1326507024  ;;  %v177_v47 = vsel %vm169_vm3, %v160_v40, %v176_v45  ;;  %v172_v11 = vsel %vm170_vm2, %v160_v40, 2102212464 }
  0x36   : > { %v181_v48 = vsel %vm169_vm3, %v163_v41, %v180_v46  ;;  %v178_v51 = vsel %vm168_vm4, %v175_v43, %v177_v47  ;;  %v173_v23 = vsel %vm169_vm3, %v157_v39, %v172_v11 }
  0x37   : > { %v182_v52 = vsel %vm168_vm4, %v179_v44, %v181_v48  ;;  %v208_v55 = vand.u32 65535, %v178_v51  ;;  %v209_v56 = vshrl.u32 %v178_v51, 16  ;;  %v174_v31 = vsel %vm168_vm4, %v171_v8, %v173_v23 }
  0x38   : > { %v186_v53 = vand.u32 65535, %v182_v52  ;;  %v187_v54 = vshrl.u32 %v182_v52, 16  ;;  %v228_v35 = vmul.u32 %v586_v37, %v174_v31  ;;  %vm278_vm4 = vweird.f32 %v577_v9 }
  0x39   : > { %v210_v61 = vmul.u32 %v208_v55, %v184_v49  ;;  %v211_v62 = vmul.u32 %v209_v56, %v184_v49  ;;  %v212_v63 = vmul.u32 %v208_v55, %v185_v50  ;;  %v213_v5 = vmul.u32 %v209_v56, %v185_v50 }
  0x3a   : > { %v188_v58 = vmul.u32 %v186_v53, %v184_v49  ;;  %v189_v59 = vmul.u32 %v187_v54, %v184_v49  ;;  %v190_v60 = vmul.u32 %v186_v53, %v185_v50  ;;  %v191_v0 = vmul.u32 %v187_v54, %v185_v50 }
  0x3b   : > { %v214_v6 = vshll.u32 %v211_v62, 16  ;;  %v216_v7 = vshll.u32 %v212_v63, 16  ;;  %v215_v21 = vshrl.u32 %v211_v62, 16  ;;  %v217_v27 = vshrl.u32 %v212_v63, 16 }
  0x3c   : > { %v192_v3 = vshll.u32 %v189_v59, 16  ;;  %v194_v4 = vshll.u32 %v190_v60, 16  ;;  %v193_v16 = vshrl.u32 %v189_v59, 16  ;;  %v195_v24 = vshrl.u32 %v190_v60, 16 }
  0x3d   : > { %vm218_vm6 = vc.u32 %v210_v61, %v214_v6  ;;  %v220_v15 = vadd.s32 %v214_v6, %v210_v61 }
  0x3e   : > { %vm196_vm5 = vc.u32 %v188_v58, %v192_v3  ;;  %v198_v10 = vadd.s32 %v192_v3, %v188_v58  ;;  %v219_v18 = vsel %vm218_vm6, 1, %v549_v13  ;;  %vm448_vm6 = vcmask 257024  }
  0x3f   : > { %v197_v14 = vsel %vm196_vm5, 1, %v549_v13  ;;  %v221_v22 = vadd.s32 %v219_v18, %v213_v5  ;;  %vm222_vm8 = vc.u32 %v220_v15, %v216_v7  ;;  %v224_v30 = vadd.s32 %v220_v15, %v216_v7 }
  0x40   : > { %v199_v17 = vadd.s32 %v197_v14, %v191_v0  ;;  %vm200_vm7 = vc.u32 %v198_v10, %v194_v4  ;;  %v223_v26 = vsel %vm222_vm8, 1, %v549_v13  ;;  %vm134_vm5 = vcmp.eq.s32.totalorder %v119_v2, 0 }
  0x41   : > { %v201_v20 = vsel %vm200_vm7, 1, %v549_v13  ;;  %v225_v28 = vadd.s32 %v223_v26, %v221_v22 }
  0x42   : > { %v203_v25 = vadd.s32 %v201_v20, %v199_v17 }
  0x43   : > { %v226_v32 = vadd.s32 %v225_v28, %v215_v21 }
  0x44   : > { %v204_v29 = vadd.s32 %v203_v25, %v193_v16 }
  0x45   : > { %v227_v34 = vadd.s32 %v226_v32, %v217_v27 }
  0x46   : > { %v205_v33 = vadd.s32 %v204_v29, %v195_v24 }
  0x47   : > { %v231_v36 = vadd.s32 1, %v227_v34 }
  0x48   : > { %vm230_vm9 = vc.u32 %v205_v33, %v224_v30  ;;  %v229_v19 = vadd.s32 %v224_v30, %v205_v33  ;;  %v445_v30 = vld [vmem:[%s107_s12] sm:$0xff] }
  0x49   : > { %v232_v38 = vsel %vm230_vm9, %v231_v36, %v227_v34 }
  0x4a   : > { %v233_v40 = vadd.s32 %v232_v38, %v228_v35 }
  0x4c   : > { %v234_v39 = vadd.s32 536870912, %v233_v40 }
  0x4e   : > { %v235_v41 = vshrl.u32 %v234_v39, 30 }
  0x50   : > { %v236_v42 = vshll.u32 %v235_v41, 30  ;;  %v259_v59 = vsub.s32 4, %v235_v41 }
  0x52   : > { %v237_v43 = vsub.s32 %v233_v40, %v236_v42  ;;  %v260_v62 = vsel %vm137_vm12, %v259_v59, %v235_v41 }
  0x53   : > { %v262_v3 = vsel %vm136_vm13, 0, %v260_v62 }
  0x54   : > { %vm238_vm10 = vcmp.lt.s32.totalorder %v237_v43, 0  ;;  %v239_v44 = vsub.s32 0, %v237_v43  ;;  %v279_v8 = vadd.s32 3, %v262_v3  ;;  %v434_v15 = vand.u32 3, %v262_v3 }
  0x56   : > { %v240_v45 = vsel %vm238_vm10, %v239_v44, %v237_v43  ;;  %v280_v12 = vand.u32 3, %v279_v8  ;;  %vm439_vm15 = vcmp.eq.s32.totalorder %v434_v15, 2  ;;  %vm436_vm2 = vcmp.eq.s32.totalorder %v434_v15, 0 }
  0x57   : > { %v241_v46 = vclz %v240_v45  ;;  %vm435_vm3 = vcmp.lt.s32.totalorder %v434_v15, 2 }
  0x58   : > { %vm285_vm14 = vcmp.eq.s32.totalorder %v280_v12, 2  ;;  %vm281_vm0 = vcmp.lt.s32.totalorder %v280_v12, 2  ;;  %vm282_vm1 = vcmp.eq.s32.totalorder %v280_v12, 0 }
  0x59   : > { %v511_v47 = vadd.s32 4294967294, %v241_v46 }
  0x5b   : > { %vm512_vm11 = vcmp.lt.s32.totalorder %v511_v47, 0 }
  0x5c   : > { %v244_v48 = vsel %vm512_vm11, 0, %v511_v47 }
  0x5d   : > { %v245_v49 = vsub.s32 32, %v244_v48  ;;  %v246_v50 = vshll.u32 %v237_v43, %v244_v48  ;;  %v249_v51 = vsub.s32 4294967266, %v244_v48 }
  0x5f   : > { %v247_v37 = vshrl.u32 %v229_v19, %v245_v49  ;;  %v250_v52 = vadd.s32 127, %v249_v51 }
  0x61   : > { %v248_v53 = vor.u32 %v247_v37, %v246_v50  ;;  %v251_v54 = vshll.u32 %v250_v52, 23 }
  0x63   : > { %v252_v55 = vor.u32 4788187, %v251_v54  ;;  %v255_v56 = vcvt.s32.f32 %v248_v53 }
  0x65   : > { %v253_v57 = vand.u32 2147483647, %v252_v55 }
  0x67   : > { %v256_v58 = vmul.f32 %v255_v56, %v253_v57 }
  0x69   : > { %v257_v60 = vxor.u32 2147483648, %v256_v58 }
  0x6b   : > { %v258_v61 = vsel %vm137_vm12, %v257_v60, %v256_v58 }
  0x6c   : > { %v261_v63 = vsel %vm136_vm13, %v577_v9, %v258_v61 }
  0x6d   : > { %v263_v0 = vmul.f32 %v261_v63, %v261_v63 }
  0x6f   : > { %v264_v4 = vmul.f32 -0.001358992, %v263_v0  ;;  %v271_v5 = vmul.f32 -0.00019511016, %v263_v0 }
  0x71   : > { %v265_v6 = vadd.f32 0.041655596, %v264_v4  ;;  %v272_v7 = vadd.f32 0.008332121, %v271_v5 }
  0x73   : > { %v266_v10 = vmul.f32 %v265_v6, %v263_v0  ;;  %v273_v11 = vmul.f32 %v272_v7, %v263_v0 }
  0x75   : > { %v267_v13 = vadd.f32 -0.4999988, %v266_v10  ;;  %v274_v14 = vadd.f32 -0.16666654, %v273_v11 }
  0x77   : > { %v268_v16 = vmul.f32 %v267_v13, %v263_v0  ;;  %v275_v17 = vmul.f32 %v274_v14, %v263_v0 }
  0x79   : > { %v269_v18 = vadd.f32 1.0, %v268_v16  ;;  %v276_v20 = vadd.f32 1.0, %v275_v17 }
  0x7b   : > { %v277_v21 = vmul.f32 %v276_v20, %v261_v63  ;;  %v286_v22 = vxor.u32 2147483648, %v269_v18 }
  0x7d   : > { %v283_v23 = vxor.u32 2147483648, %v277_v21  ;;  %v287_v24 = vsel %vm285_vm14, %v286_v22, %v277_v21  ;;  %v441_v25 = vsel %vm439_vm15, %v286_v22, %v277_v21 }
  0x7f   : > { %v284_v26 = vsel %vm282_vm1, %v269_v18, %v283_v23  ;;  %v438_v27 = vsel %vm436_vm2, %v269_v18, %v283_v23 }
  0x80   : > { %v288_v28 = vsel %vm281_vm0, %v284_v26, %v287_v24  ;;  %v442_v29 = vsel %vm435_vm3, %v438_v27, %v441_v25 }
  0x81   : > { %v289_v31 = vsel %vm278_vm4, nan, %v288_v28  ;;  %v443_v32 = vsel %vm278_vm4, nan, %v442_v29 }
  0x82   : > { %v444_v33 = vsel %vm134_vm5, %v289_v31, %v443_v32 }
  0x83   : > { %v446_v34 = vadd.f32 %v445_v30, %v444_v33 }
  0x85   : > { %v447_v35 = vpack.c.bf16 %v446_v34, %v446_v34 }
  0x87   : > { %449 = vst.msk [vmem:[%s111_s16] sm:$0xf] %vm448_vm6, %v447_v35 }
  0x88 PF: > { %s11_s6 = sadd.s32 1, %s541_s6  }
  0x89   : > { %p8_p4 = scmp.ge.s32.totalorder %s11_s6, 4  }
  0x8b   :  { %10 = sbr.rel (!%p8_p4) target bundleno = 1 (0x1), region = 54 }

// kernel: feature_transformer_forward.21
= control target key start
LH: loop header
LB: loop body
LE: loop exit
PB: predicated region body
PF: predicated region fallthrough
CT: control target
= control target key end

     0   :  { %vm42_vm0 = vcmask 261120   ;;  %vm62_vm1 = vcmask 781312   ;;  %s124_s1 = inlined_call_operand.vmem [shape: bf16[32,96], index: 1, kind: input, shape index: {}]   ;;  %s125_s2 = inlined_call_operand.vmem [shape: f32[1,96], index: 2, kind: input, shape index: {}]   ;;  %s126_s0 = inlined_call_operand.vmem [shape: bf16[16,32], index: 0, kind: input, shape index: {}]   ;;  %s127_s3 = inlined_call_operand.vmem [shape: bf16[16,96], index: 3, kind: output, shape index: {}]  }
   0x1   :  { %v84_v0 = vld [vmem:[%s124_s1 + $0x8] sm:$0xff]  ;;  %v83_v1 = vld [vmem:[%s124_s1] sm:$0xff] }
   0x2   :  { %52 = vmatpush.bf16.msra.mxu0 %v84_v0  ;;  %v82_v2 = vld [vmem:[%s126_s0] sm:$0xff] }
   0x3   :  { %v85_v3 = vld [vmem:[%s125_s2] ss:$0 sm:$0xff] }
   0x6   :  { %53 = vmatpush.bf16.msra.mxu0 %v83_v1 }
   0x9   :  { %81 = vmatmul.msk.bf16.vlgmr.msra.gmra.mxu0 %vm42_vm0, %v82_v2 }
  0x86   :  { %v55_v4 = vpop.f32.mrf.mxu0 }
  0x87   :  { %v56_v5 = vadd.f32 %v85_v3, %v55_v4 }
  0x89   :  { %v60_v6 = vpack.c.bf16 %v56_v5, %v56_v5 }
  0x8b   :  { %63 = vst.msk [vmem:[%s127_s3] sm:$0xf] %vm62_vm1, %v60_v6 }
  0x8e   :  { %v57_v7 = vpop.f32.mrf.mxu0 }
  0x8f   :  { %v58_v8 = vadd.f32 %v85_v3, %v57_v7 }
  0x91   :  { %v61_v9 = vpack.c.bf16 %v58_v8, %v58_v8 }
  0x93   :  { %64 = vst.msk [vmem:[%s127_s3 + $0x4] sm:$0xf] %vm62_vm1, %v61_v9 }

// kernel: feature_transformer_forward.22
= control target key start
LH: loop header
LB: loop body
LE: loop exit
PB: predicated region body
PF: predicated region fallthrough
CT: control target
= control target key end

     0   :  { %s684_s15 = smov 0   ;;  %s686_s16 = smov 0   ;;  %s755_s0 = inlined_call_operand.vmem [shape: bf16[2,4,8,8], index: 0, kind: input, shape index: {}]   ;;  %s756_s1 = inlined_call_operand.vmem [shape: bf16[2,4,8,8], index: 1, kind: input, shape index: {}]   ;;  %s757_s2 = inlined_call_operand.vmem [shape: bf16[2,4,8,8], index: 2, kind: input, shape index: {}]   ;;  %s758_s3 = inlined_call_operand.vmem [shape: f32[2,1,8], index: 3, kind: input, shape index: {}]   ;;  %s759_s4 = inlined_call_operand.vmem [shape: bf16[2,4,8,8], index: 4, kind: output, shape index: {}]  }
   0x1   :  { %s688_s17 = smov 0   ;;  %s690_s18 = smov 0  }
   0x2   :  { %s692_s19 = smov 0  }
   0x3 LB: > { %s29_s20 = sadd.s32 1, %s648_s17  ;;  %s33_s21 = sadd.s32 1, %s652_s18  ;;  %s656_s19 = sphi %s692_s19, %s14_s19   ;;  %s652_s18 = sphi %s690_s18, %s763_s18   ;;  %s648_s17 = sphi %s688_s17, %s762_s17   ;;  %s644_s16 = sphi %s686_s16, %s761_s16   ;;  %s640_s15 = sphi %s684_s15, %s760_s15  }
   0x4   : > { %p31_p0 = scmp.ge.s32.totalorder %s29_s20, 4  ;;  %p559_p1 = scmp.ge.s32.totalorder %s656_s19, 1 }
   0x5   : > { %p233_p2 = scmp.lt.s32.totalorder %s656_s19, 9 }
   0x6   : > { %s765_s20 = smov (%p31_p0, %s29_s20), 0  ;;  %s767_s21 = smov (!%p31_p0, %s33_s21), %s652_s18 }
   0x7   : > { %p234_p3 = pnand %p559_p1, %p233_p2  ;;  %p35_p4 = scmp.ge.s32.totalorder %s767_s21, 2 }
   0x8   : > { %p290_p5 = scmp.lt.s32.totalorder (!%p234_p3), %s644_s16, 1  ;;  %p292_p6 = scmp.lt.s32.totalorder (!%p234_p3), %s640_s15, 3 }
   0x9   : > { %s769_s21 = smov (%p35_p4, %s767_s21), 0  ;;  %237 = sbr.rel (%p234_p3) target bundleno = 552 (0x228), region = 36 }
   0xe   : > { %s771_s16 = smov (!%p290_p5, %s644_s16), 1  ;;  %s773_s15 = smov (!%p292_p6, %s640_s15), 3  ;;  %vm349_vm0 = vcmask 64512   ;;  %v333_v3 = vlaneseq  ;;  %v658_v7 = vmov 0.0   ;;  %vm388_vm2 = vcmask 1043456  }
   0xf   : > { %s560_s22 = sshll.u32 %s771_s16, 2  ;;  %s319_s7 = scalar_lea.vmem %s758_s3, %s771_s16  ;;  %vm406_vm3 = vcmask 60416  }
  0x10   : > { %s298_s23 = sadd.s32 %s560_s22, %s773_s15  ;;  %v334_v4 = vshrl.u32 %v333_v3, 7  ;;  %v338_v5 = vand.u32 127, %v333_v3  ;;  %v613_v6 = vld [vmem:[%s319_s7] ss:$0 sm:$0xff] }
  0x11   : > { %s714_s24 = sshll.u32 %s298_s23, 2 }
  0x12   : > { %s308_s27 = scalar_lea.vmem %s756_s1, %s714_s24  ;;  %s300_s30 = scalar_lea.vmem %s755_s0, %s714_s24  ;;  %vm339_vm1 = vcmp.gt.s32.totalorder %v338_v5, %v334_v4 }
  0x13   : > { %v347_v0 = vld [vmem:[%s308_s27] sm:$0xf]  ;;  %v340_v8 = vsel %vm339_vm1, -inf, %v658_v7  ;;  %s316_s10 = scalar_lea.vmem %s757_s2, %s714_s24  ;;  %s330_s13 = scalar_lea.vmem %s759_s4, %s714_s24 }
  0x14   : > { %v354_v1 = vsel %vm349_vm0, %v347_v0, 0  ;;  %v346_v2 = vld [vmem:[%s300_s30] sm:$0xf]  ;;  %v345_v9 = vadd.f32 %v613_v6, %v340_v8 }
  0x15   : > { %363 = vmatpush.bf16.xpose.msra.mxu0 %v354_v1  ;;  %v348_v21 = vld [vmem:[%s316_s10] sm:$0xf] }
  0x16   : > { %v390_v22 = vsel %vm388_vm2, %v348_v21, 0 }
  0x17   : > { %399 = vmatpush.bf16.msra.mxu1 %v390_v22 }
  0x1c   : > { %568 = vmatmul.msk.bf16.vlgmr.msra.gmra.mxu0 %vm349_vm0, %v346_v2 }
  0x99   : > { %v365_v10 = vpop.f32.mrf.mxu0 }
  0x9a   : > { %v369_v11 = vmul.f32 0.35355338, %v365_v10 }
  0x9c   : > { %v370_v12 = vadd.f32 %v369_v11, %v345_v9 }
  0x9e   : > { %v371_v13 = vsel %vm349_vm0, %v370_v12, -inf }
  0x9f   : > { %372 = vmax.xlane.f32.xlu0 %v371_v13 }
  0xa1   : > { %v367_v14 = vpop.f32.mrf.mxu0 }
 0x112   : > { %v373_v15 = vpop.xlane.xlu0 %372 }
 0x113   : > { %v374_v16 = vmax.f32 %v373_v15, -1e+30 }
 0x115   : > { %v375_v17 = vsub.f32 %v370_v12, %v374_v16 }
 0x117   : > { %v376_v18 = vmul.f32 1.442695, %v375_v17 }
 0x119   : > { %614 = vpow2.f32 %v376_v18 }
 0x11f   : > { %v615_v19 = vpop.eup %614 }
 0x120   : > { %v378_v20 = vsel %vm349_vm0, %v615_v19, 0.0 }
 0x121   : > { %379 = vadd.xlane.f32.xlu0 %v378_v20 }
 0x194   : > { %v380_v23 = vpop.xlane.xlu0 %379 }
 0x195   : > { %v381_v24 = vmax.f32 %v380_v23, 1e-30 }
 0x197   : > { %616 = vrcp.f32 %v381_v24 }
 0x19d   : > { %v617_v25 = vpop.eup %616 }
 0x19e   : > { %v383_v26 = vmul.f32 %v617_v25, %v615_v19 }
 0x1a0   : > { %v384_v27 = vpack.c.bf16 %v383_v26, %v383_v26 }
 0x1a2   : > { %569 = vmatmul.msk.bf16.vlgmr.msra.gmra.mxu1 %vm349_vm0, %v384_v27 }
 0x21f   : > { %v401_v28 = vpop.f32.mrf.mxu1 }
 0x220   : > { %v405_v29 = vpack.c.bf16 %v401_v28, %v401_v28 }
 0x222   : > { %407 = vst.msk [vmem:[%s330_s13] sm:$0xf] %vm406_vm3, %v405_v29 }
 0x227   : > { %v403_v30 = vpop.f32.mrf.mxu1 }
 0x228 PF: > { %s14_s19 = sadd.s32 1, %s656_s19   ;;  %s760_s15 = smov %s648_s17 }
 0x229   : > { %p11_p7 = scmp.ge.s32.totalorder %s14_s19, 10   ;;  %s761_s16 = smov %s652_s18 }
 0x22a   : > { %s762_s17 = smov %s765_s20  ;;  %s763_s18 = smov %s769_s21 }
 0x22b   :  { %13 = sbr.rel (!%p11_p7) target bundleno = 3 (0x3), region = 75 }

// kernel: feature_transformer_forward.23
= control target key start
LH: loop header
LB: loop body
LE: loop exit
PB: predicated region body
PF: predicated region fallthrough
CT: control target
= control target key end

     0   :  { %vm51_vm0 = vcmask 261120   ;;  %v177_v15 = vmov 32.0   ;;  %vm140_vm6 = vcmask 257024   ;;  %s245_s1 = inlined_call_operand.vmem [shape: bf16[32,32], index: 1, kind: input, shape index: {}]   ;;  %s246_s2 = inlined_call_operand.vmem [shape: f32[1,32], index: 2, kind: input, shape index: {}]   ;;  %s247_s0 = inlined_call_operand.vmem [shape: bf16[16,32], index: 0, kind: input, shape index: {}]   ;;  %s248_s3 = inlined_call_operand.vmem [shape: bf16[16,32], index: 3, kind: input, shape index: {}]   ;;  %s249_s4 = inlined_call_operand.vmem [shape: f32[1,32], index: 4, kind: input, shape index: {}]   ;;  %s250_s5 = inlined_call_operand.vmem [shape: f32[1,32], index: 5, kind: input, shape index: {}]   ;;  %s251_s6 = inlined_call_operand.vmem [shape: bf16[16,32], index: 6, kind: output, shape index: {}]  }
   0x1   :  { %v162_v0 = vld [vmem:[%s245_s1 + $0x8] sm:$0xff]  ;;  %v161_v1 = vld [vmem:[%s245_s1] sm:$0xff]  ;;  %171 = vrcp.f32 %v177_v15 }
   0x2   :  { %61 = vmatpush.bf16.msra.mxu0 %v162_v0  ;;  %v160_v2 = vld [vmem:[%s247_s0] sm:$0xff] }
   0x3   :  { %v164_v3 = vld [vmem:[%s248_s3] sm:$0xff]  }
   0x4   :  { %v168_v4 = vld [vmem:[%s246_s2] ss:$0 sm:$0xff]  ;;  %v165_v5 = vunpack.c.l.bf16 %v164_v3  ;;  %v166_v10 = vunpack.c.h.bf16 %v164_v3 }
   0x5   :  { %v169_v46 = vld [vmem:[%s249_s4] ss:$0 sm:$0xff] }
   0x6   :  { %62 = vmatpush.bf16.msra.mxu0 %v161_v1  ;;  %v170_v49 = vld [vmem:[%s250_s5] ss:$0 sm:$0xff] }
   0x7   :  { %v172_v16 = vpop.eup %171 }
   0x8   :  { %v82_v17 = vmul.f32 32.0, %v172_v16  ;;  %vm86_vm1 = vweird.f32 %v172_v16 }
   0x9   :  { %159 = vmatmul.msk.bf16.vlgmr.msra.gmra.mxu0 %vm51_vm0, %v160_v2 }
   0xa   :  { %v83_v18 = vsub.f32 1.0, %v82_v17 }
   0xc   :  { %v84_v19 = vmul.f32 %v172_v16, %v83_v18 }
   0xe   :  { %v85_v20 = vadd.f32 %v172_v16, %v84_v19 }
  0x10   :  { %v87_v21 = vsel %vm86_vm1, %v172_v16, %v85_v20 }
  0x86   :  { %v64_v6 = vpop.f32.mrf.mxu0 }
  0x87   :  { %v65_v7 = vadd.f32 %v168_v4, %v64_v6 }
  0x89   :  { %v73_v8 = vadd.f32 %v165_v5, %v65_v7 }
  0x8b   :  { %v75_v9 = vsel %vm51_vm0, %v73_v8, 0.0 }
  0x8c   :  { %76 = vadd.xlane.f32.xlu0 %v75_v9 }
  0x8e   :  { %v66_v11 = vpop.f32.mrf.mxu0 }
  0x8f   :  { %v67_v12 = vadd.f32 %v168_v4, %v66_v11 }
  0x91   :  { %v74_v13 = vadd.f32 %v166_v10, %v67_v12 }
  0x93   :  { %v78_v14 = vsel %vm51_vm0, %v74_v13, 0.0 }
  0x94   :  { %79 = vadd.xlane.f32.xlu0 %v78_v14 }
  0xff   :  { %v77_v22 = vpop.xlane.xlu0 %76 }
 0x100   :  { %v88_v23 = vmul.f32 %v87_v21, %v77_v22 }
 0x102   :  { %v90_v24 = vsub.f32 %v73_v8, %v88_v23 }
 0x104   :  { %v92_v25 = vmul.f32 %v90_v24, %v90_v24 }
 0x106   :  { %v94_v26 = vsel %vm51_vm0, %v92_v25, 0.0 }
 0x107   :  { %95 = vadd.xlane.f32.xlu1 %v94_v26  ;;  %v80_v27 = vpop.xlane.xlu0 %79 }
 0x108   :  { %v89_v28 = vmul.f32 %v87_v21, %v80_v27 }
 0x10a   :  { %v91_v29 = vsub.f32 %v74_v13, %v89_v28 }
 0x10c   :  { %v93_v30 = vmul.f32 %v91_v29, %v91_v29 }
 0x10e   :  { %v97_v31 = vsel %vm51_vm0, %v93_v30, 0.0 }
 0x10f   :  { %98 = vadd.xlane.f32.xlu1 %v97_v31 }
 0x17a   :  { %v96_v32 = vpop.xlane.xlu1 %95 }
 0x17b   :  { %v100_v33 = vmul.f32 %v96_v32, %v87_v21 }
 0x17d   :  { %v102_v34 = vadd.f32 1e-05, %v100_v33 }
 0x17f   :  { %173 = vrsqrt.f32 %v102_v34  ;;  %vm110_vm3 = vweird.f32 %v102_v34 }
 0x182   :  { %v99_v35 = vpop.xlane.xlu1 %98 }
 0x183   :  { %v101_v36 = vmul.f32 %v99_v35, %v87_v21 }
 0x185   :  { %v174_v37 = vpop.eup %173  ;;  %v103_v38 = vadd.f32 1e-05, %v101_v36 }
 0x186   :  { %v105_v39 = vmul.f32 %v174_v37, %v102_v34  ;;  %vm111_vm2 = vweird.f32 %v174_v37 }
 0x187   :  { %175 = vrsqrt.f32 %v103_v38  ;;  %vm112_vm4 = vmor %vm110_vm3, %vm111_vm2  ;;  %vm120_vm7 = vweird.f32 %v103_v38 }
 0x188   :  { %v106_v40 = vmul.f32 %v174_v37, %v105_v39 }
 0x18a   :  { %v107_v41 = vmul.f32 0.5, %v106_v40 }
 0x18c   :  { %v108_v42 = vsub.f32 1.5, %v107_v41 }
 0x18d   :  { %v176_v43 = vpop.eup %175 }
 0x18e   :  { %v109_v44 = vmul.f32 %v174_v37, %v108_v42  ;;  %v115_v45 = vmul.f32 %v176_v43, %v103_v38  ;;  %vm121_vm5 = vweird.f32 %v176_v43 }
 0x18f   :  { %vm122_vm8 = vmor %vm120_vm7, %vm121_vm5 }
 0x190   :  { %v113_v47 = vsel %vm112_vm4, %v174_v37, %v109_v44  ;;  %v116_v48 = vmul.f32 %v176_v43, %v115_v45 }
 0x191   :  { %v124_v50 = vmul.f32 %v113_v47, %v90_v24 }
 0x192   :  { %v117_v51 = vmul.f32 0.5, %v116_v48 }
 0x193   :  { %v130_v52 = vmul.f32 %v169_v46, %v124_v50 }
 0x194   :  { %v118_v53 = vsub.f32 1.5, %v117_v51 }
 0x195   :  { %v136_v54 = vadd.f32 %v170_v49, %v130_v52 }
 0x196   :  { %v119_v55 = vmul.f32 %v176_v43, %v118_v53 }
 0x197   :  { %v138_v56 = vpack.c.bf16 %v136_v54, %v136_v54 }
 0x198   :  { %v123_v57 = vsel %vm122_vm8, %v176_v43, %v119_v55 }
 0x199   :  { %141 = vst.msk [vmem:[%s251_s6] sm:$0xf] %vm140_vm6, %v138_v56  ;;  %v125_v58 = vmul.f32 %v123_v57, %v91_v29 }
 0x19b   :  { %v131_v59 = vmul.f32 %v169_v46, %v125_v58 }
 0x19d   :  { %v137_v60 = vadd.f32 %v170_v49, %v131_v59 }
 0x19f   :  { %v139_v61 = vpack.c.bf16 %v137_v60, %v137_v60 }
 0x1a1   :  { %142 = vst.msk [vmem:[%s251_s6 + $0x4] sm:$0xf] %vm140_vm6, %v139_v61 }

// kernel: feature_transformer_forward.24
= control target key start
LH: loop header
LB: loop body
LE: loop exit
PB: predicated region body
PF: predicated region fallthrough
CT: control target
= control target key end

     0   :  { %vm42_vm0 = vcmask 261120   ;;  %vm62_vm1 = vcmask 257024   ;;  %s124_s1 = inlined_call_operand.vmem [shape: bf16[32,32], index: 1, kind: input, shape index: {}]   ;;  %s125_s2 = inlined_call_operand.vmem [shape: f32[1,32], index: 2, kind: input, shape index: {}]   ;;  %s126_s0 = inlined_call_operand.vmem [shape: bf16[16,32], index: 0, kind: input, shape index: {}]   ;;  %s127_s3 = inlined_call_operand.vmem [shape: bf16[16,32], index: 3, kind: output, shape index: {}]  }
   0x1   :  { %v84_v0 = vld [vmem:[%s124_s1 + $0x8] sm:$0xff]  ;;  %v83_v1 = vld [vmem:[%s124_s1] sm:$0xff] }
   0x2   :  { %52 = vmatpush.bf16.msra.mxu0 %v84_v0  ;;  %v82_v2 = vld [vmem:[%s126_s0] sm:$0xff] }
   0x3   :  { %v85_v3 = vld [vmem:[%s125_s2] ss:$0 sm:$0xff] }
   0x6   :  { %53 = vmatpush.bf16.msra.mxu0 %v83_v1 }
   0x9   :  { %81 = vmatmul.msk.bf16.vlgmr.msra.gmra.mxu0 %vm42_vm0, %v82_v2 }
  0x86   :  { %v55_v4 = vpop.f32.mrf.mxu0 }
  0x87   :  { %v56_v5 = vadd.f32 %v85_v3, %v55_v4 }
  0x89   :  { %v60_v6 = vpack.c.bf16 %v56_v5, %v56_v5 }
  0x8b   :  { %63 = vst.msk [vmem:[%s127_s3] sm:$0xf] %vm62_vm1, %v60_v6 }
  0x8e   :  { %v57_v7 = vpop.f32.mrf.mxu0 }
  0x8f   :  { %v58_v8 = vadd.f32 %v85_v3, %v57_v7 }
  0x91   :  { %v61_v9 = vpack.c.bf16 %v58_v8, %v58_v8 }
  0x93   :  { %64 = vst.msk [vmem:[%s127_s3 + $0x4] sm:$0xf] %vm62_vm1, %v61_v9 }

// kernel: feature_transformer_forward.25
= control target key start
LH: loop header
LB: loop body
LE: loop exit
PB: predicated region body
PF: predicated region fallthrough
CT: control target
= control target key end

     0   :  { %vm42_vm0 = vcmask 261120   ;;  %vm62_vm1 = vcmask 519168   ;;  %s124_s1 = inlined_call_operand.vmem [shape: bf16[32,64], index: 1, kind: input, shape index: {}]   ;;  %s125_s2 = inlined_call_operand.vmem [shape: f32[1,64], index: 2, kind: input, shape index: {}]   ;;  %s126_s0 = inlined_call_operand.vmem [shape: bf16[16,32], index: 0, kind: input, shape index: {}]   ;;  %s127_s3 = inlined_call_operand.vmem [shape: bf16[16,64], index: 3, kind: output, shape index: {}]  }
   0x1   :  { %v84_v0 = vld [vmem:[%s124_s1 + $0x8] sm:$0xff]  ;;  %v83_v1 = vld [vmem:[%s124_s1] sm:$0xff] }
   0x2   :  { %52 = vmatpush.bf16.msra.mxu0 %v84_v0  ;;  %v82_v2 = vld [vmem:[%s126_s0] sm:$0xff] }
   0x3   :  { %v85_v3 = vld [vmem:[%s125_s2] ss:$0 sm:$0xff] }
   0x6   :  { %53 = vmatpush.bf16.msra.mxu0 %v83_v1 }
   0x9   :  { %81 = vmatmul.msk.bf16.vlgmr.msra.gmra.mxu0 %vm42_vm0, %v82_v2 }
  0x86   :  { %v55_v4 = vpop.f32.mrf.mxu0 }
  0x87   :  { %v56_v5 = vadd.f32 %v85_v3, %v55_v4 }
  0x89   :  { %v60_v6 = vpack.c.bf16 %v56_v5, %v56_v5 }
  0x8b   :  { %63 = vst.msk [vmem:[%s127_s3] sm:$0xf] %vm62_vm1, %v60_v6 }
  0x8e   :  { %v57_v7 = vpop.f32.mrf.mxu0 }
  0x8f   :  { %v58_v8 = vadd.f32 %v85_v3, %v57_v7 }
  0x91   :  { %v61_v9 = vpack.c.bf16 %v58_v8, %v58_v8 }
  0x93   :  { %64 = vst.msk [vmem:[%s127_s3 + $0x4] sm:$0xf] %vm62_vm1, %v61_v9 }

// kernel: feature_transformer_forward.28
= control target key start
LH: loop header
LB: loop body
LE: loop exit
PB: predicated region body
PF: predicated region fallthrough
CT: control target
= control target key end

     0   :  { %s695_s12 = smov 0   ;;  %s697_s13 = smov 0   ;;  %s788_s0 = inlined_call_operand.vmem [shape: bf16[16,32], index: 0, kind: input, shape index: {}]   ;;  %s789_s1 = inlined_call_operand.vmem [shape: bf16[32,2048], index: 1, kind: input, shape index: {}]   ;;  %s790_s2 = inlined_call_operand.vmem [shape: f32[1,2048], index: 2, kind: input, shape index: {}]   ;;  %s791_s3 = inlined_call_operand.vmem [shape: bf16[16,2048], index: 3, kind: output, shape index: {}]  }
   0x1   :  { %s699_s14 = smov 0   ;;  %s701_s15 = smov 0  }
   0x2   :  { %s703_s16 = smov 0  }
   0x3 LB: > { %s25_s17 = sadd.s32 1, %s669_s15  ;;  %s527_s18 = sadd.s32 4294967295, %s673_s16   ;;  %s673_s16 = sphi %s703_s16, %s13_s16   ;;  %s669_s15 = sphi %s701_s15, %s796_s15   ;;  %s665_s14 = sphi %s699_s14, %s795_s14   ;;  %s661_s13 = sphi %s697_s13, %s794_s13   ;;  %s657_s12 = sphi %s695_s12, %s793_s12  }
   0x4   : > { %p27_p0 = scmp.ge.s32.totalorder %s25_s17, 4  ;;  %p65_p1 = scmp.ne.s32.totalorder %s661_s13, %s657_s12 }
   0x5   : > { %p66_p2 = scmp.eq.s32.totalorder %s673_s16, 0  ;;  %p123_p4 = scmp.eq.s32.totalorder %s527_s18, 3 }
   0x6   : > { %s798_s17 = smov (%p27_p0, %s25_s17), 0  ;;  %s58_s20 = sadd.s32 1, %s661_s13 }
   0x7   : > { %p67_p3 = por %p66_p2, %p65_p1  ;;  %s55_s19 = ssub.s32 %s669_s15, %s798_s17 }
   0x8   : > { %p56_p5 = scmp.eq.s32.totalorder %s55_s19, 0  ;;  %p730_p6 = por %p123_p4, %p65_p1 }
   0x9   : > { %p531_p7 = scmp.ge.s32.totalorder %s673_s16, 4 }
   0xa   : > { %s735_s22 = scalar_select %p56_p5, %s661_s13, %s58_s20  }
   0xb   : > { %154 = sbr.rel (%p531_p7) target bundleno = 28 (0x1c), region = 20 }
  0x10   : > { %157 = sbr.rel (!%p67_p3) target bundleno = 28 (0x1c), region = 24  ;;  %s159_s23 = sand.u32 (%p67_p3), 1, %s661_s13  }
  0x11   : > { %s584_s24 = sshll.u32 (%p67_p3), %s669_s15, 4  ;;  %s532_s25 = sshll.u32 (%p67_p3), %s159_s23, 6 }
  0x12   : > { %s164_s28 = scalar_lea.vmem (%p67_p3), %s789_s1, %s584_s24  ;;  %s161_s29 = scalar_lea.vmem (%p67_p3), [#allocation2], %s532_s25 }
  0x13   : > { %v177_v0 = vld [vmem:[%s164_s28] sm:$0xff] (%p67_p3)  ;;  %v179_v1 = vld [vmem:[%s164_s28 + $0x8] sm:$0xff] (%p67_p3) }
  0x14   : > { %v181_v2 = vld [vmem:[%s164_s28 + $0x40] sm:$0xff] (%p67_p3)  ;;  %178 = vst [vmem:[%s161_s29] sm:$0xff] (%p67_p3), %v177_v0  ;;  %v183_v3 = vld [vmem:[%s164_s28 + $0x48] sm:$0xff] (%p67_p3) }
  0x15   : > { %180 = vst [vmem:[%s161_s29 + $0x8] sm:$0xff] %v179_v1  ;;  %v185_v4 = vld [vmem:[%s164_s28 + $0x80] sm:$0xff]  ;;  %v187_v5 = vld [vmem:[%s164_s28 + $0x88] sm:$0xff] }
  0x16   : > { %182 = vst [vmem:[%s161_s29 + $0x10] sm:$0xff] %v181_v2  ;;  %v189_v6 = vld [vmem:[%s164_s28 + $0xc0] sm:$0xff]  ;;  %v191_v7 = vld [vmem:[%s164_s28 + $0xc8] sm:$0xff] }
  0x17   : > { %184 = vst [vmem:[%s161_s29 + $0x18] sm:$0xff] %v183_v3 }
  0x18   : > { %186 = vst [vmem:[%s161_s29 + $0x20] sm:$0xff] %v185_v4 }
  0x19   : > { %188 = vst [vmem:[%s161_s29 + $0x28] sm:$0xff] %v187_v5 }
  0x1a   : > { %190 = vst [vmem:[%s161_s29 + $0x30] sm:$0xff] %v189_v6 }
  0x1b   : > { %192 = vst [vmem:[%s161_s29 + $0x38] sm:$0xff] %v191_v7 }
  0x1c PF: > { %p535_p8 = scmp.ge.s32.totalorder %s673_s16, 1  ;;  %p205_p9 = scmp.lt.s32.totalorder %s673_s16, 5 }
  0x1e   : > { %p206_p10 = pnand %p535_p8, %p205_p9 }
  0x1f   : > { %s212_s30 = sand.u32 (!%p206_p10), 1, %s657_s12   ;;  %s538_s8 = sshll.u32 (!%p206_p10), %s665_s14, 2 }
  0x20   : > { %209 = sbr.rel (%p206_p10) target bundleno = 204 (0xcc), region = 51  ;;  %s536_s4 = sshll.u32 (!%p206_p10), %s212_s30, 6 }
  0x21   : > { %s214_s5 = scalar_lea.vmem (!%p206_p10), [#allocation2], %s536_s4  ;;  %p251_p11 = scmp.lt.s32.totalorder (!%p206_p10), %s538_s8, 15 }
  0x22   : > { %s537_s18 = sshll.u32 (!%p206_p10), %s212_s30, 5 }
  0x23   : > { %s757_s19 = scalar_lea.vmem (!%p206_p10), [#allocation3], %s537_s18 }
  0x25   : > { %v561_v8 = vld [vmem:[%s214_s5 + $0x20] sm:$0xf]  ;;  %v592_v9 = vld [vmem:[%s214_s5 + $0x2c] sm:$0xf0]  ;;  %v590_v10 = vld [vmem:[%s214_s5 + $0x24] sm:$0xf] }
  0x26   : > { %v562_v11 = vor.u32 %v592_v9, %v561_v8  ;;  %v563_v12 = vld [vmem:[%s214_s5 + $0x30] sm:$0xf0]  ;;  %v569_v13 = vld [vmem:[%s214_s5 + $0x28] sm:$0xf]  ;;  %v593_v14 = vld [vmem:[%s214_s5 + $0x34] sm:$0xf0] }
  0x27   : > { %v566_v15 = vor.u32 %v590_v10, %v563_v12  ;;  %v570_v16 = vor.u32 %v593_v14, %v569_v13  ;;  %v591_v17 = vld [vmem:[%s214_s5 + $0x2c] sm:$0xf]  ;;  %v571_v18 = vld [vmem:[%s214_s5 + $0x38] sm:$0xf0]  ;;  %v545_v19 = vld [vmem:[%s214_s5] sm:$0xf] }
  0x28   : > { %333 = vmatpush.bf16.msra.mxu0 %v562_v11  ;;  %v574_v20 = vor.u32 %v591_v17, %v571_v18  ;;  %v588_v21 = vld [vmem:[%s214_s5 + $0xc] sm:$0xf0]  ;;  %v586_v22 = vld [vmem:[%s214_s5 + $0x4] sm:$0xf]  ;;  %v547_v23 = vld [vmem:[%s214_s5 + $0x10] sm:$0xf0] }
  0x29   : > { %347 = vmatpush.bf16.msra.mxu1 %v566_v15  ;;  %361 = vmatpush.bf16.msra.mxu2 %v570_v16  ;;  %v546_v24 = vor.u32 %v588_v21, %v545_v19  ;;  %v550_v25 = vor.u32 %v586_v22, %v547_v23  ;;  %v553_v26 = vld [vmem:[%s214_s5 + $0x8] sm:$0xf]  ;;  %v589_v27 = vld [vmem:[%s214_s5 + $0x14] sm:$0xf0]  ;;  %v587_v28 = vld [vmem:[%s214_s5 + $0xc] sm:$0xf] }
  0x2a   : > { %375 = vmatpush.bf16.msra.mxu3 %v574_v20  ;;  %v554_v29 = vor.u32 %v589_v27, %v553_v26  ;;  %v555_v30 = vld [vmem:[%s214_s5 + $0x18] sm:$0xf0]  ;;  %v585_v32 = vld [vmem:[%s788_s0] sm:$0xff]  ;;  %vm323_vm0 = vcmask 261120   ;;  %s800_s8 = smov (!%p251_p11, %s538_s8), 15  ;;  %s594_s12 = sshll.u32 (%p730_p6), %s665_s14, 4 }
  0x2b   : > { %v558_v31 = vor.u32 %v587_v28, %v555_v30  ;;  %s253_s11 = scalar_lea.vmem %s790_s2, %s800_s8  ;;  %s411_s24 = scalar_lea.vmem (%p730_p6), %s791_s3, %s594_s12 }
  0x2c   : > { %334 = vmatpush.bf16.msra.mxu0 %v546_v24  ;;  %v268_v33 = vld [vmem:[%s253_s11] sm:$0xf] }
  0x2d   : > { %348 = vmatpush.bf16.msra.mxu1 %v550_v25  ;;  %362 = vmatpush.bf16.msra.mxu2 %v554_v29  ;;  %v270_v34 = vperm.slane %v268_v33, 0  ;;  %v271_v35 = vperm.slane %v268_v33, 1  ;;  %v272_v42 = vperm.slane %v268_v33, 2  ;;  %v273_v43 = vperm.slane %v268_v33, 3 }
  0x2e   : > { %376 = vmatpush.bf16.msra.mxu3 %v558_v31 }
  0x2f   : > { %575 = vmatmul.msk.bf16.vlgmr.msra.gmra.mxu0 %vm323_vm0, %v585_v32 }
  0x30   : > { %576 = vmatmul.msk.bf16.vlgmr.msra.gmra.mxu1 %vm323_vm0, %v585_v32  ;;  %577 = vmatmul.msk.bf16.vlgmr.msra.gmra.mxu2 %vm323_vm0, %v585_v32 }
  0x31   : > { %578 = vmatmul.msk.bf16.vlgmr.msra.gmra.mxu3 %vm323_vm0, %v585_v32 }
  0xac   : > { %v336_v36 = vpop.f32.mrf.mxu0 }
  0xad   : > { %v337_v37 = vadd.f32 %v336_v36, %v270_v34  ;;  %v350_v38 = vpop.f32.mrf.mxu1 }
  0xae   : > { %v351_v39 = vadd.f32 %v350_v38, %v271_v35 }
  0xaf   : > { %v383_v40 = vmax.f32 %v337_v37, 0.0 }
  0xb0   : > { %v384_v41 = vmax.f32 %v351_v39, 0.0 }
  0xb2   : > { %v391_v44 = vpack.c.bf16 %v384_v41, %v383_v40 }
  0xb3   : > { %v364_v45 = vpop.f32.mrf.mxu2 }
  0xb4   : > { %395 = vst [vmem:[%s757_s19] sm:$0xff] %v391_v44  ;;  %v365_v46 = vadd.f32 %v364_v45, %v272_v42  ;;  %v378_v47 = vpop.f32.mrf.mxu3  ;;  %v338_v48 = vpop.f32.mrf.mxu0 }
  0xb5   : > { %v379_v49 = vadd.f32 %v378_v47, %v273_v43  ;;  %v339_v50 = vadd.f32 %v338_v48, %v270_v34  ;;  %v352_v51 = vpop.f32.mrf.mxu1 }
  0xb6   : > { %v385_v52 = vmax.f32 %v365_v46, 0.0  ;;  %v353_v53 = vadd.f32 %v352_v51, %v271_v35 }
  0xb7   : > { %v386_v54 = vmax.f32 %v379_v49, 0.0  ;;  %v387_v55 = vmax.f32 %v339_v50, 0.0 }
  0xb8   : > { %v388_v56 = vmax.f32 %v353_v53, 0.0 }
  0xb9   : > { %v392_v57 = vpack.c.bf16 %v386_v54, %v385_v52 }
  0xba   : > { %v393_v58 = vpack.c.bf16 %v388_v56, %v387_v55 }
  0xbb   : > { %396 = vst [vmem:[%s757_s19 + $0x8] sm:$0xff] %v392_v57  ;;  %v366_v59 = vpop.f32.mrf.mxu2  ;;  %v424_v2 = vld [vmem:[%s757_s19] sm:$0xff] (%p730_p6) }
  0xbc   : > { %397 = vst [vmem:[%s757_s19 + $0x10] sm:$0xff] %v393_v58  ;;  %v367_v60 = vadd.f32 %v366_v59, %v272_v42  ;;  %v380_v61 = vpop.f32.mrf.mxu3 }
  0xbd   : > { %v381_v62 = vadd.f32 %v380_v61, %v273_v43  ;;  %425 = vst [vmem:[%s411_s24] sm:$0xff] (%p730_p6), %v424_v2 }
  0xbe   : > { %v389_v63 = vmax.f32 %v367_v60, 0.0 }
  0xbf   : > { %v390_v0 = vmax.f32 %v381_v62, 0.0  ;;  %405 = sbr.rel (!%p730_p6) target bundleno = 204 (0xcc), region = 59 }
  0xc1   : > { %v394_v1 = vpack.c.bf16 %v390_v0, %v389_v63 }
  0xc2   : > { %v426_v3 = vld [vmem:[%s757_s19 + $0x8] sm:$0xff] (%p730_p6) }
  0xc3   : > { %398 = vst [vmem:[%s757_s19 + $0x18] sm:$0xff] %v394_v1  ;;  %v428_v4 = vld [vmem:[%s757_s19 + $0x10] sm:$0xff] (%p730_p6) }
  0xc4   : > { %427 = vst [vmem:[%s411_s24 + $0x8] sm:$0xff] %v426_v3 }
  0xc5   : > { %429 = vst [vmem:[%s411_s24 + $0x40] sm:$0xff] %v428_v4 }
  0xca   : > { %v430_v5 = vld [vmem:[%s757_s19 + $0x18] sm:$0xff] }
  0xcb   : > { %431 = vst [vmem:[%s411_s24 + $0x48] sm:$0xff] %v430_v5 }
  0xcc PF: > { %s13_s16 = sadd.s32 1, %s673_s16   ;;  %s793_s12 = smov %s661_s13 }
  0xcd   : > { %p10_p12 = scmp.ge.s32.totalorder %s13_s16, 6   ;;  %s794_s13 = smov %s735_s22 }
  0xce   : > { %s795_s14 = smov %s669_s15  ;;  %s796_s15 = smov %s798_s17 }
  0xcf   :  { %12 = sbr.rel (!%p10_p12) target bundleno = 3 (0x3), region = 119 }

// kernel: feature_transformer_forward.26
= control target key start
LH: loop header
LB: loop body
LE: loop exit
PB: predicated region body
PF: predicated region fallthrough
CT: control target
= control target key end

     0   :  { %s611_s12 = smov 0   ;;  %s613_s13 = smov 0   ;;  %s679_s0 = inlined_call_operand.vmem [shape: bf16[2,4,8,8], index: 0, kind: input, shape index: {}]   ;;  %s680_s1 = inlined_call_operand.vmem [shape: bf16[2,4,8,8], index: 1, kind: input, shape index: {}]   ;;  %s681_s2 = inlined_call_operand.vmem [shape: bf16[2,4,8,8], index: 2, kind: input, shape index: {}]   ;;  %s682_s3 = inlined_call_operand.vmem [shape: bf16[2,4,8,8], index: 3, kind: output, shape index: {}]  }
   0x1   :  { %s615_s14 = smov 0   ;;  %s617_s15 = smov 0  }
   0x2   :  { %s619_s16 = smov 0  }
   0x3 LB: > { %s28_s17 = sadd.s32 1, %s581_s14  ;;  %s32_s18 = sadd.s32 1, %s585_s15  ;;  %s589_s16 = sphi %s619_s16, %s13_s16   ;;  %s585_s15 = sphi %s617_s15, %s686_s15   ;;  %s581_s14 = sphi %s615_s14, %s685_s14   ;;  %s577_s13 = sphi %s613_s13, %s684_s13   ;;  %s573_s12 = sphi %s611_s12, %s683_s12  }
   0x4   : > { %p30_p0 = scmp.ge.s32.totalorder %s28_s17, 4  ;;  %p494_p1 = scmp.ge.s32.totalorder %s589_s16, 1 }
   0x5   : > { %p200_p2 = scmp.lt.s32.totalorder %s589_s16, 9 }
   0x6   : > { %s688_s17 = smov (%p30_p0, %s28_s17), 0  ;;  %s690_s18 = smov (!%p30_p0, %s32_s18), %s585_s15 }
   0x7   : > { %p201_p3 = pnand %p494_p1, %p200_p2  ;;  %p34_p4 = scmp.ge.s32.totalorder %s690_s18, 2 }
   0x8   : > { %p252_p5 = scmp.lt.s32.totalorder (!%p201_p3), %s577_s13, 1  ;;  %p254_p6 = scmp.lt.s32.totalorder (!%p201_p3), %s573_s12, 3 }
   0x9   : > { %s692_s18 = smov (%p34_p4, %s690_s18), 0  ;;  %204 = sbr.rel (%p201_p3) target bundleno = 550 (0x226), region = 32 }
   0xe   : > { %s694_s13 = smov (!%p252_p5, %s577_s13), 1  ;;  %s696_s12 = smov (!%p254_p6, %s573_s12), 3  ;;  %vm294_vm0 = vcmask 64512   ;;  %vm332_vm1 = vcmask 1043456   ;;  %vm350_vm2 = vcmask 60416  }
   0xf   : > { %s495_s19 = sshll.u32 %s694_s13, 2 }
  0x10   : > { %s260_s20 = sadd.s32 %s495_s19, %s696_s12 }
  0x11   : > { %s641_s21 = sshll.u32 %s260_s20, 2 }
  0x12   : > { %s270_s24 = scalar_lea.vmem %s680_s1, %s641_s21  ;;  %s262_s27 = scalar_lea.vmem %s679_s0, %s641_s21 }
  0x13   : > { %v292_v0 = vld [vmem:[%s270_s24] sm:$0xf]  ;;  %s278_s30 = scalar_lea.vmem %s681_s2, %s641_s21  ;;  %s289_s6 = scalar_lea.vmem %s682_s3, %s641_s21 }
  0x14   : > { %v299_v1 = vsel %vm294_vm0, %v292_v0, 0  ;;  %v291_v2 = vld [vmem:[%s262_s27] sm:$0xf] }
  0x15   : > { %308 = vmatpush.bf16.xpose.msra.mxu0 %v299_v1  ;;  %v293_v13 = vld [vmem:[%s278_s30] sm:$0xf] }
  0x16   : > { %v334_v14 = vsel %vm332_vm1, %v293_v13, 0 }
  0x17   : > { %343 = vmatpush.bf16.msra.mxu1 %v334_v14 }
  0x1c   : > { %503 = vmatmul.msk.bf16.vlgmr.msra.gmra.mxu0 %vm294_vm0, %v291_v2 }
  0x99   : > { %v310_v3 = vpop.f32.mrf.mxu0 }
  0x9a   : > { %v314_v4 = vmul.f32 0.35355338, %v310_v3 }
  0x9c   : > { %v315_v5 = vsel %vm294_vm0, %v314_v4, -inf }
  0x9d   : > { %316 = vmax.xlane.f32.xlu0 %v315_v5 }
  0xa1   : > { %v312_v6 = vpop.f32.mrf.mxu0 }
 0x110   : > { %v317_v7 = vpop.xlane.xlu0 %316 }
 0x111   : > { %v318_v8 = vmax.f32 %v317_v7, -1e+30 }
 0x113   : > { %v319_v9 = vsub.f32 %v314_v4, %v318_v8 }
 0x115   : > { %v320_v10 = vmul.f32 1.442695, %v319_v9 }
 0x117   : > { %547 = vpow2.f32 %v320_v10 }
 0x11d   : > { %v548_v11 = vpop.eup %547 }
 0x11e   : > { %v322_v12 = vsel %vm294_vm0, %v548_v11, 0.0 }
 0x11f   : > { %323 = vadd.xlane.f32.xlu0 %v322_v12 }
 0x192   : > { %v324_v15 = vpop.xlane.xlu0 %323 }
 0x193   : > { %v325_v16 = vmax.f32 %v324_v15, 1e-30 }
 0x195   : > { %549 = vrcp.f32 %v325_v16 }
 0x19b   : > { %v550_v17 = vpop.eup %549 }
 0x19c   : > { %v327_v18 = vmul.f32 %v550_v17, %v548_v11 }
 0x19e   : > { %v328_v19 = vpack.c.bf16 %v327_v18, %v327_v18 }
 0x1a0   : > { %504 = vmatmul.msk.bf16.vlgmr.msra.gmra.mxu1 %vm294_vm0, %v328_v19 }
 0x21d   : > { %v345_v20 = vpop.f32.mrf.mxu1 }
 0x21e   : > { %v349_v21 = vpack.c.bf16 %v345_v20, %v345_v20 }
 0x220   : > { %351 = vst.msk [vmem:[%s289_s6] sm:$0xf] %vm350_vm2, %v349_v21 }
 0x225   : > { %v347_v22 = vpop.f32.mrf.mxu1 }
 0x226 PF: > { %s13_s16 = sadd.s32 1, %s589_s16   ;;  %s683_s12 = smov %s581_s14 }
 0x227   : > { %p10_p7 = scmp.ge.s32.totalorder %s13_s16, 10   ;;  %s684_s13 = smov %s585_s15 }
 0x228   : > { %s685_s14 = smov %s688_s17  ;;  %s686_s15 = smov %s692_s18 }
 0x229   :  { %12 = sbr.rel (!%p10_p7) target bundleno = 3 (0x3), region = 68 }

// kernel: feature_transformer_forward.29
= control target key start
LH: loop header
LB: loop body
LE: loop exit
PB: predicated region body
PF: predicated region fallthrough
CT: control target
= control target key end

     0   :  { %s1206_s21 = smov 0   ;;  %s1208_s22 = smov 0   ;;  %s1341_s0 = inlined_call_operand.vmem [shape: bf16[16,2048], index: 0, kind: input, shape index: {}]   ;;  %s1342_s1 = inlined_call_operand.vmem [shape: bf16[2048,32], index: 1, kind: input, shape index: {}]   ;;  %s1343_s2 = inlined_call_operand.vmem [shape: f32[1,32], index: 2, kind: input, shape index: {}]   ;;  %s1344_s3 = inlined_call_operand.vmem [shape: bf16[16,32], index: 3, kind: input, shape index: {}]   ;;  %s1345_s4 = inlined_call_operand.vmem [shape: f32[1,32], index: 4, kind: input, shape index: {}]   ;;  %s1346_s5 = inlined_call_operand.vmem [shape: f32[1,32], index: 5, kind: input, shape index: {}]   ;;  %s1347_s6 = inlined_call_operand.vmem [shape: bf16[16,32], index: 6, kind: output, shape index: {}]  }
   0x1   :  { %s1210_s23 = smov 0   ;;  %s1212_s24 = smov 0  }
   0x2   :  { %s1214_s25 = smov 0  }
   0x3 LB: > { %s25_s26 = sadd.s32 1, %s1163_s24  ;;  %p44_p1 = scmp.ne.s32.totalorder %s1155_s22, %s1151_s21  ;;  %s1167_s25 = sphi %s1214_s25, %s16_s25   ;;  %s1163_s24 = sphi %s1212_s24, %s1351_s24   ;;  %s1159_s23 = sphi %s1210_s23, %s1350_s23   ;;  %s1155_s22 = sphi %s1208_s22, %s1349_s22   ;;  %s1151_s21 = sphi %s1206_s21, %s1348_s21  }
   0x4   : > { %p26_p0 = scmp.ge.s32.totalorder %s25_s26, 4  ;;  %p45_p2 = scmp.eq.s32.totalorder %s1167_s25, 0 }
   0x5   : > { %s37_s28 = sadd.s32 1, %s1155_s22  ;;  %p879_p5 = scmp.ge.s32.totalorder %s1167_s25, 4 }
   0x6   : > { %s1353_s26 = smov (%p26_p0, %s25_s26), 0  ;;  %p46_p3 = por %p45_p2, %p44_p1 }
   0x7   : > { %s33_s27 = ssub.s32 %s1163_s24, %s1353_s26  ;;  %229 = sbr.rel (%p879_p5) target bundleno = 20 (0x14), region = 32 }
   0x8   : > { %p35_p4 = scmp.eq.s32.totalorder %s33_s27, 0 }
   0xa   : > { %s1241_s29 = scalar_select %p35_p4, %s1155_s22, %s37_s28  }
   0xc   : > { %232 = sbr.rel (!%p46_p3) target bundleno = 20 (0x14), region = 36  ;;  %s234_s30 = sand.u32 (%p46_p3), 1, %s1155_s22  }
   0xd   : > { %s1037_s7 = sshll.u32 (%p46_p3), %s1163_s24, 4  ;;  %s880_s8 = sshll.u32 (%p46_p3), %s234_s30, 5 }
   0xe   : > { %s242_s11 = scalar_lea.vmem (%p46_p3), %s1341_s0, %s1037_s7  ;;  %s236_s12 = scalar_lea.vmem (%p46_p3), [#allocation3], %s880_s8 }
   0xf   : > { %v255_v0 = vld [vmem:[%s242_s11] sm:$0xff] (%p46_p3)  ;;  %v257_v1 = vld [vmem:[%s242_s11 + $0x8] sm:$0xff] (%p46_p3) }
  0x10   : > { %v259_v2 = vld [vmem:[%s242_s11 + $0x40] sm:$0xff] (%p46_p3)  ;;  %256 = vst [vmem:[%s236_s12] sm:$0xff] (%p46_p3), %v255_v0  ;;  %v261_v3 = vld [vmem:[%s242_s11 + $0x48] sm:$0xff] (%p46_p3) }
  0x11   : > { %258 = vst [vmem:[%s236_s12 + $0x8] sm:$0xff] %v257_v1 }
  0x12   : > { %260 = vst [vmem:[%s236_s12 + $0x10] sm:$0xff] %v259_v2 }
  0x13   : > { %262 = vst [vmem:[%s236_s12 + $0x18] sm:$0xff] %v261_v3 }
  0x14 PF: > { %p883_p6 = scmp.ge.s32.totalorder %s1167_s25, 1  ;;  %p276_p7 = scmp.lt.s32.totalorder %s1167_s25, 5 }
  0x16   : > { %p277_p8 = pnand %p883_p6, %p276_p7 }
  0x17   : > { %s283_s13 = sand.u32 (!%p277_p8), 1, %s1151_s21   ;;  %s885_s14 = sshll.u32 (!%p277_p8), %s1159_s23, 6 }
  0x18   : > { %280 = sbr.rel (%p277_p8) target bundleno = 504 (0x1f8), region = 63  ;;  %s884_s15 = sshll.u32 (!%p277_p8), %s283_s13, 5 }
  0x19   : > { %p325_p9 = scmp.lt.s32.totalorder (!%p277_p8), %s885_s14, 255  ;;  %s1258_s20 = scalar_lea.vmem (!%p277_p8), [#allocation3], %s884_s15 }
  0x1a   : > { %p887_p10 = scmp.ne.s32.totalorder (!%p277_p8), %s1159_s23, 0 }
  0x1d   : > { %s1355_s14 = smov (!%p325_p9, %s885_s14), 255  ;;  %345 = sbr.rel (%p887_p10) target bundleno = 37 (0x25), region = 71 }
  0x1e   : > { %s886_s16 = sshll.u32 %s1355_s14, 2 }
  0x1f   : > { %s1256_s19 = scalar_lea.vmem %s1342_s1, %s886_s16 }
  0x22   : > { %vm346_vm0 = vcmask 261120   ;;  %v1169_v4 = vmov 0.0  }
  0x23   : > { %347 = vst.msk [vmem:[#allocation2] sm:$0xff] %vm346_vm0, %v1169_v4 }
  0x24   : > { %348 = vst.msk [vmem:[#allocation2 + $0x8] sm:$0xff] %vm346_vm0, %v1169_v4 }
  0x25 PF: > { %v1049_v5 = vld [vmem:[%s1256_s19 + $0x38] sm:$0xff]  ;;  %v1048_v9 = vld [vmem:[%s1256_s19 + $0x30] sm:$0xff]  ;;  %v1047_v13 = vld [vmem:[%s1256_s19 + $0x28] sm:$0xff]  ;;  %vm689_vm1 = vcmask 261120   ;;  %p1032_p11 = scmp.ne.s32.totalorder %s1159_s23, 3 }
  0x26   : > { %v1057_v6 = vld [vmem:[%s1256_s19 + $0x78] sm:$0xff]  ;;  %631 = vmatpush.bf16.msra.mxu0 %v1049_v5  ;;  %v1056_v10 = vld [vmem:[%s1256_s19 + $0x70] sm:$0xff]  ;;  %v1055_v14 = vld [vmem:[%s1256_s19 + $0x68] sm:$0xff] }
  0x27   : > { %v1065_v7 = vld [vmem:[%s1256_s19 + $0xb8] sm:$0xff]  ;;  %645 = vmatpush.bf16.msra.mxu1 %v1057_v6  ;;  %v1064_v11 = vld [vmem:[%s1256_s19 + $0xb0] sm:$0xff]  ;;  %v1063_v15 = vld [vmem:[%s1256_s19 + $0xa8] sm:$0xff] }
  0x28   : > { %v1073_v8 = vld [vmem:[%s1256_s19 + $0xf8] sm:$0xff]  ;;  %659 = vmatpush.bf16.msra.mxu2 %v1065_v7  ;;  %v1072_v12 = vld [vmem:[%s1256_s19 + $0xf0] sm:$0xff]  ;;  %v1071_v16 = vld [vmem:[%s1256_s19 + $0xe8] sm:$0xff] }
  0x29   : > { %673 = vmatpush.bf16.msra.mxu3 %v1073_v8  ;;  %v1046_v17 = vld [vmem:[%s1256_s19 + $0x20] sm:$0xff]  ;;  %v1045_v21 = vld [vmem:[%s1256_s19 + $0x18] sm:$0xff]  ;;  %v1044_v25 = vld [vmem:[%s1256_s19 + $0x10] sm:$0xff] }
  0x2a   : > { %632 = vmatpush.bf16.msra.mxu0 %v1048_v9  ;;  %v1054_v18 = vld [vmem:[%s1256_s19 + $0x60] sm:$0xff]  ;;  %v1053_v22 = vld [vmem:[%s1256_s19 + $0x58] sm:$0xff]  ;;  %v1052_v26 = vld [vmem:[%s1256_s19 + $0x50] sm:$0xff] }
  0x2b   : > { %646 = vmatpush.bf16.msra.mxu1 %v1056_v10  ;;  %v1062_v19 = vld [vmem:[%s1256_s19 + $0xa0] sm:$0xff]  ;;  %v1061_v23 = vld [vmem:[%s1256_s19 + $0x98] sm:$0xff]  ;;  %v1060_v27 = vld [vmem:[%s1256_s19 + $0x90] sm:$0xff] }
  0x2c   : > { %660 = vmatpush.bf16.msra.mxu2 %v1064_v11  ;;  %v1070_v20 = vld [vmem:[%s1256_s19 + $0xe0] sm:$0xff]  ;;  %v1069_v24 = vld [vmem:[%s1256_s19 + $0xd8] sm:$0xff]  ;;  %v1068_v28 = vld [vmem:[%s1256_s19 + $0xd0] sm:$0xff] }
  0x2d   : > { %674 = vmatpush.bf16.msra.mxu3 %v1072_v12  ;;  %v1043_v29 = vld [vmem:[%s1256_s19 + $0x8] sm:$0xff]  ;;  %v1042_v33 = vld [vmem:[%s1256_s19] sm:$0xff]  ;;  %v890_v37 = vld [vmem:[%s1258_s20] sm:$0xf] }
  0x2e   : > { %633 = vmatpush.bf16.msra.mxu0 %v1047_v13  ;;  %v1051_v30 = vld [vmem:[%s1256_s19 + $0x48] sm:$0xff]  ;;  %v1050_v34 = vld [vmem:[%s1256_s19 + $0x40] sm:$0xff]  ;;  %v1038_v39 = vld [vmem:[%s1258_s20 + $0x4] sm:$0xf] }
  0x2f   : > { %647 = vmatpush.bf16.msra.mxu1 %v1055_v14  ;;  %v1059_v31 = vld [vmem:[%s1256_s19 + $0x88] sm:$0xff]  ;;  %v1058_v35 = vld [vmem:[%s1256_s19 + $0x80] sm:$0xff]  ;;  %v898_v41 = vld [vmem:[%s1258_s20 + $0x8] sm:$0xf] }
  0x30   : > { %661 = vmatpush.bf16.msra.mxu2 %v1063_v15  ;;  %v1067_v32 = vld [vmem:[%s1256_s19 + $0xc8] sm:$0xff]  ;;  %v1066_v36 = vld [vmem:[%s1256_s19 + $0xc0] sm:$0xff]  ;;  %v1039_v43 = vld [vmem:[%s1258_s20 + $0xc] sm:$0xf] }
  0x31   : > { %675 = vmatpush.bf16.msra.mxu3 %v1071_v16  ;;  %v1040_v38 = vld [vmem:[%s1258_s20 + $0xc] sm:$0xf0]  ;;  %v892_v40 = vld [vmem:[%s1258_s20 + $0x10] sm:$0xf0]  ;;  %v1041_v42 = vld [vmem:[%s1258_s20 + $0x14] sm:$0xf0] }
  0x32   : > { %634 = vmatpush.bf16.msra.mxu0 %v1046_v17  ;;  %v900_v44 = vld [vmem:[%s1258_s20 + $0x18] sm:$0xf0]  ;;  %v891_v45 = vor.u32 %v1040_v38, %v890_v37  ;;  %v895_v46 = vor.u32 %v1038_v39, %v892_v40  ;;  %v899_v47 = vor.u32 %v1041_v42, %v898_v41  ;;  %v349_v55 = vld [vmem:[#allocation2] sm:$0xff] }
  0x33   : > { %648 = vmatpush.bf16.msra.mxu1 %v1054_v18  ;;  %v903_v48 = vor.u32 %v1039_v43, %v900_v44  ;;  %v350_v63 = vld [vmem:[#allocation2 + $0x8] sm:$0xff] }
  0x34   : > { %662 = vmatpush.bf16.msra.mxu2 %v1062_v19 }
  0x35   : > { %676 = vmatpush.bf16.msra.mxu3 %v1070_v20 }
  0x36   : > { %635 = vmatpush.bf16.msra.mxu0 %v1045_v21 }
  0x37   : > { %649 = vmatpush.bf16.msra.mxu1 %v1053_v22 }
  0x38   : > { %663 = vmatpush.bf16.msra.mxu2 %v1061_v23 }
  0x39   : > { %677 = vmatpush.bf16.msra.mxu3 %v1069_v24 }
  0x3a   : > { %636 = vmatpush.bf16.msra.mxu0 %v1044_v25 }
  0x3b   : > { %650 = vmatpush.bf16.msra.mxu1 %v1052_v26 }
  0x3c   : > { %664 = vmatpush.bf16.msra.mxu2 %v1060_v27 }
  0x3d   : > { %678 = vmatpush.bf16.msra.mxu3 %v1068_v28 }
  0x3e   : > { %637 = vmatpush.bf16.msra.mxu0 %v1043_v29 }
  0x3f   : > { %651 = vmatpush.bf16.msra.mxu1 %v1051_v30 }
  0x40   : > { %665 = vmatpush.bf16.msra.mxu2 %v1059_v31 }
  0x41   : > { %679 = vmatpush.bf16.msra.mxu3 %v1067_v32 }
  0x42   : > { %638 = vmatpush.bf16.msra.mxu0 %v1042_v33 }
  0x43   : > { %652 = vmatpush.bf16.msra.mxu1 %v1050_v34 }
  0x44   : > { %666 = vmatpush.bf16.msra.mxu2 %v1058_v35 }
  0x45   : > { %680 = vmatpush.bf16.msra.mxu3 %v1066_v36  ;;  %639 = vmatmul.bf16.vlgmr.msra.gmra.mxu0 %v891_v45 }
  0x46   : > { %653 = vmatmul.bf16.vlgmr.msra.gmra.mxu1 %v895_v46 }
  0x47   : > { %667 = vmatmul.bf16.vlgmr.msra.gmra.mxu2 %v899_v47 }
  0x48   : > { %681 = vmatmul.bf16.vlgmr.msra.gmra.mxu3 %v903_v48 }
  0xc2   : > { %v640_v49 = vpop.f32.mrf.mxu0 }
  0xc3   : > { %v654_v50 = vpop.f32.mrf.mxu1 }
  0xc4   : > { %v655_v51 = vadd.f32 %v654_v50, %v640_v49 }
  0xca   : > { %v668_v52 = vpop.f32.mrf.mxu2  ;;  %v642_v57 = vpop.f32.mrf.mxu0 }
  0xcb   : > { %v682_v53 = vpop.f32.mrf.mxu3  ;;  %v669_v54 = vadd.f32 %v668_v52, %v655_v51  ;;  %v656_v58 = vpop.f32.mrf.mxu1 }
  0xcc   : > { %v657_v60 = vadd.f32 %v656_v58, %v642_v57 }
  0xcd   : > { %v683_v56 = vadd.f32 %v682_v53, %v669_v54 }
  0xcf   : > { %v687_v59 = vadd.f32 %v683_v56, %v349_v55 }
  0xd1   : > { %690 = vst.msk [vmem:[#allocation2] sm:$0xff] %vm689_vm1, %v687_v59 }
  0xd2   : > { %v670_v61 = vpop.f32.mrf.mxu2 }
  0xd3   : > { %v671_v62 = vadd.f32 %v670_v61, %v657_v60  ;;  %v684_v0 = vpop.f32.mrf.mxu3 }
  0xd5   : > { %v685_v1 = vadd.f32 %v684_v0, %v671_v62  ;;  %695 = sbr.rel (%p1032_p11) target bundleno = 504 (0x1f8), region = 75 }
  0xd7   : > { %v688_v2 = vadd.f32 %v685_v1, %v350_v63 }
  0xd9   : > { %691 = vst.msk [vmem:[#allocation2 + $0x8] sm:$0xff] %vm689_vm1, %v688_v2 }
  0xda   : > { %v696_v3 = vld [vmem:[#allocation2] sm:$0xff]  ;;  %v1170_v15 = vmov 32.0   ;;  %vm775_vm7 = vcmask 257024  }
  0xdb   : > { %v1120_v4 = vld [vmem:[%s1343_s2] ss:$0 sm:$0xff]  ;;  %1123 = vrcp.f32 %v1170_v15 }
  0xdc   : > { %v1075_v5 = vld [vmem:[%s1344_s3] sm:$0xff]   ;;  %v702_v7 = vadd.f32 %v1120_v4, %v696_v3 }
  0xdd   : > { %v1076_v8 = vunpack.c.l.bf16 %v1075_v5  ;;  %v1077_v11 = vunpack.c.h.bf16 %v1075_v5  ;;  %v1121_v46 = vld [vmem:[%s1345_s4] ss:$0 sm:$0xff] }
  0xde   : > { %v1122_v49 = vld [vmem:[%s1346_s5] ss:$0 sm:$0xff] }
  0xdf   : > { %v708_v9 = vadd.f32 %v1076_v8, %v702_v7 }
  0xe0   : > { %v697_v6 = vld [vmem:[#allocation2 + $0x8] sm:$0xff] }
  0xe1   : > { %v703_v10 = vadd.f32 %v1120_v4, %v697_v6  ;;  %v710_v12 = vsel %vm689_vm1, %v708_v9, 0.0  ;;  %v1124_v16 = vpop.eup %1123 }
  0xe2   : > { %711 = vadd.xlane.f32.xlu0 %v710_v12  ;;  %v717_v17 = vmul.f32 32.0, %v1124_v16  ;;  %vm721_vm2 = vweird.f32 %v1124_v16 }
  0xe3   : > { %v709_v13 = vadd.f32 %v1077_v11, %v703_v10 }
  0xe4   : > { %v718_v18 = vsub.f32 1.0, %v717_v17 }
  0xe5   : > { %v713_v14 = vsel %vm689_vm1, %v709_v13, 0.0 }
  0xe6   : > { %v719_v19 = vmul.f32 %v1124_v16, %v718_v18 }
  0xe8   : > { %v720_v20 = vadd.f32 %v1124_v16, %v719_v19 }
  0xea   : > { %714 = vadd.xlane.f32.xlu0 %v713_v14  ;;  %v722_v21 = vsel %vm721_vm2, %v1124_v16, %v720_v20 }
 0x155   : > { %v712_v22 = vpop.xlane.xlu0 %711 }
 0x156   : > { %v723_v23 = vmul.f32 %v722_v21, %v712_v22 }
 0x158   : > { %v725_v24 = vsub.f32 %v708_v9, %v723_v23 }
 0x15a   : > { %v727_v25 = vmul.f32 %v725_v24, %v725_v24 }
 0x15c   : > { %v729_v26 = vsel %vm689_vm1, %v727_v25, 0.0 }
 0x15d   : > { %730 = vadd.xlane.f32.xlu1 %v729_v26  ;;  %v715_v27 = vpop.xlane.xlu0 %714 }
 0x15e   : > { %v724_v28 = vmul.f32 %v722_v21, %v715_v27 }
 0x160   : > { %v726_v29 = vsub.f32 %v709_v13, %v724_v28 }
 0x162   : > { %v728_v30 = vmul.f32 %v726_v29, %v726_v29 }
 0x164   : > { %v732_v31 = vsel %vm689_vm1, %v728_v30, 0.0 }
 0x165   : > { %733 = vadd.xlane.f32.xlu1 %v732_v31 }
 0x1d0   : > { %v731_v32 = vpop.xlane.xlu1 %730 }
 0x1d1   : > { %v735_v33 = vmul.f32 %v731_v32, %v722_v21 }
 0x1d3   : > { %v737_v34 = vadd.f32 1e-05, %v735_v33 }
 0x1d5   : > { %1125 = vrsqrt.f32 %v737_v34  ;;  %vm745_vm4 = vweird.f32 %v737_v34 }
 0x1d8   : > { %v734_v35 = vpop.xlane.xlu1 %733 }
 0x1d9   : > { %v736_v36 = vmul.f32 %v734_v35, %v722_v21 }
 0x1db   : > { %v1126_v37 = vpop.eup %1125  ;;  %v738_v38 = vadd.f32 1e-05, %v736_v36 }
 0x1dc   : > { %v740_v39 = vmul.f32 %v1126_v37, %v737_v34  ;;  %vm746_vm3 = vweird.f32 %v1126_v37 }
 0x1dd   : > { %1127 = vrsqrt.f32 %v738_v38  ;;  %vm747_vm5 = vmor %vm745_vm4, %vm746_vm3  ;;  %vm755_vm8 = vweird.f32 %v738_v38 }
 0x1de   : > { %v741_v40 = vmul.f32 %v1126_v37, %v740_v39 }
 0x1e0   : > { %v742_v41 = vmul.f32 0.5, %v741_v40 }
 0x1e2   : > { %v743_v42 = vsub.f32 1.5, %v742_v41 }
 0x1e3   : > { %v1128_v43 = vpop.eup %1127 }
 0x1e4   : > { %v744_v44 = vmul.f32 %v1126_v37, %v743_v42  ;;  %v750_v45 = vmul.f32 %v1128_v43, %v738_v38  ;;  %vm756_vm6 = vweird.f32 %v1128_v43 }
 0x1e5   : > { %vm757_vm9 = vmor %vm755_vm8, %vm756_vm6 }
 0x1e6   : > { %v748_v47 = vsel %vm747_vm5, %v1126_v37, %v744_v44  ;;  %v751_v48 = vmul.f32 %v1128_v43, %v750_v45 }
 0x1e7   : > { %v759_v50 = vmul.f32 %v748_v47, %v725_v24 }
 0x1e8   : > { %v752_v51 = vmul.f32 0.5, %v751_v48 }
 0x1e9   : > { %v765_v52 = vmul.f32 %v1121_v46, %v759_v50 }
 0x1ea   : > { %v753_v53 = vsub.f32 1.5, %v752_v51 }
 0x1eb   : > { %v771_v54 = vadd.f32 %v1122_v49, %v765_v52 }
 0x1ec   : > { %v754_v55 = vmul.f32 %v1128_v43, %v753_v53 }
 0x1ed   : > { %v773_v56 = vpack.c.bf16 %v771_v54, %v771_v54 }
 0x1ee   : > { %v758_v57 = vsel %vm757_vm9, %v1128_v43, %v754_v55 }
 0x1ef   : > { %776 = vst.msk [vmem:[%s1347_s6] sm:$0xf] %vm775_vm7, %v773_v56  ;;  %v760_v58 = vmul.f32 %v758_v57, %v726_v29 }
 0x1f1   : > { %v766_v59 = vmul.f32 %v1121_v46, %v760_v58 }
 0x1f3   : > { %v772_v60 = vadd.f32 %v1122_v49, %v766_v59 }
 0x1f5   : > { %v774_v61 = vpack.c.bf16 %v772_v60, %v772_v60 }
 0x1f7   : > { %777 = vst.msk [vmem:[%s1347_s6 + $0x4] sm:$0xf] %vm775_vm7, %v774_v61 }
 0x1f8 PF: > { %s16_s25 = sadd.s32 1, %s1167_s25   ;;  %s1348_s21 = smov %s1155_s22 }
 0x1f9   : > { %p13_p12 = scmp.ge.s32.totalorder %s16_s25, 6   ;;  %s1349_s22 = smov %s1241_s29 }
 0x1fa   : > { %s1350_s23 = smov %s1163_s24  ;;  %s1351_s24 = smov %s1353_s26 }
 0x1fb   :  { %15 = sbr.rel (!%p13_p12) target bundleno = 3 (0x3), region = 116 }

// kernel: feature_transformer_forward.39
= control target key start
LH: loop header
LB: loop body
LE: loop exit
PB: predicated region body
PF: predicated region fallthrough
CT: control target
= control target key end

     0   :  { %s458_s12 = smov 0   ;;  %s460_s13 = smov 0   ;;  %s510_s0 = inlined_call_operand.vmem [shape: bf16[2,8,32], index: 0, kind: input, shape index: {}]   ;;  %s511_s1 = inlined_call_operand.vmem [shape: bf16[16,32], index: 1, kind: input, shape index: {}]   ;;  %s512_s2 = inlined_call_operand.vmem [shape: f32[16,1], index: 2, kind: input, shape index: {}]   ;;  %s513_s3 = inlined_call_operand.vmem [shape: f32[2,16,8], index: 3, kind: output, shape index: {}]  }
   0x1   :  { %s462_s14 = smov 0  }
   0x2 LB: > { %s25_s15 = sadd.s32 1, %s431_s13  ;;  %p368_p0 = scmp.ge.s32.totalorder %s435_s14, 1  ;;  %s435_s14 = sphi %s462_s14, %s13_s14   ;;  %s431_s13 = sphi %s460_s13, %s515_s13   ;;  %s427_s12 = sphi %s458_s12, %s514_s12  }
   0x3   : > { %p27_p1 = scmp.ge.s32.totalorder %s25_s15, 2  ;;  %p155_p2 = scmp.lt.s32.totalorder %s435_s14, 3 }
   0x5   : > { %s517_s15 = smov (%p27_p1, %s25_s15), 0  ;;  %p156_p3 = pnand %p368_p0, %p155_p2 }
   0x6   : > { %p184_p4 = scmp.lt.s32.totalorder (!%p156_p3), %s427_s12, 1 }
   0x7   : > { %159 = sbr.rel (%p156_p3) target bundleno = 223 (0xdf), region = 32 }
   0xc   : > { %v203_v0 = vld [vmem:[%s512_s2] sm:$0xff]  ;;  %v437_v1 = vmov 0   ;;  %s519_s12 = smov (!%p184_p4, %s427_s12), 1  ;;  %vm220_vm0 = vcmask 261120   ;;  %v204_v4 = vld [vmem:[%s512_s2 + $0x8] sm:$0xff]  ;;  %vm241_vm1 = vcmask 64512  }
   0xd   : > { %406 = vset.pattern.permute.xlu0 %v437_v1  ;;  %s369_s18 = sshll.u32 %s519_s12, 2  ;;  %v380_v5 = vld [vmem:[%s511_s1] sm:$0xff]  ;;  %s379_s26 = sshll.u32 %s519_s12, 4 }
   0xe   : > { %207 = vperm.xlu0 %406, %v203_v0   ;;  %s190_s21 = scalar_lea.vmem %s510_s0, %s369_s18  ;;  %s198_s29 = scalar_lea.vmem %s513_s3, %s379_s26 }
   0xf   : > { %v202_v2 = vld [vmem:[%s190_s21] sm:$0xf] }
  0x10   : > { %v225_v3 = vsel %vm220_vm0, %v202_v2, 0 }
  0x11   : > { %234 = vmatpush.bf16.xpose.msra.mxu0 %v225_v3 }
  0x16   : > { %212 = vperm.xlu0 %406, %v204_v4  }
  0x18   : > { %376 = vmatmul.msk.bf16.vlgmr.msra.gmra.mxu0 %vm220_vm0, %v380_v5 }
  0x80   : > { %v208_v6 = vpop.permute.xlu0 %207 }
  0x88   : > { %v213_v9 = vpop.permute.xlu0 %212 }
  0x95   : > { %v236_v7 = vpop.f32.mrf.mxu0 }
  0x96   : > { %v237_v8 = vadd.f32 %v236_v7, %v208_v6 }
  0x98   : > { %v242_v12 = vsel %vm241_vm1, %v237_v8, -inf }
  0x9d   : > { %v238_v10 = vpop.f32.mrf.mxu0 }
  0x9e   : > { %v239_v11 = vadd.f32 %v238_v10, %v213_v9 }
  0xa0   : > { %v243_v13 = vsel %vm241_vm1, %v239_v11, -inf }
  0xa1   : > { %v244_v14 = vmax.f32 %v242_v12, %v243_v13 }
  0xa3   : > { %v245_v15 = vrot.slane %v244_v14, 4 }
  0xa5   : > { %v246_v16 = vmax.f32 %v244_v14, %v245_v15 }
  0xa7   : > { %v247_v17 = vrot.slane %v246_v16, 2 }
  0xa9   : > { %v248_v18 = vmax.f32 %v246_v16, %v247_v17 }
  0xab   : > { %v249_v19 = vrot.slane %v248_v18, 1 }
  0xad   : > { %v250_v20 = vmax.f32 %v248_v18, %v249_v19 }
  0xaf   : > { %v251_v21 = vsub.f32 %v237_v8, %v250_v20  ;;  %v252_v22 = vsub.f32 %v239_v11, %v250_v20 }
  0xb1   : > { %v253_v23 = vmul.f32 1.442695, %v251_v21  ;;  %v255_v24 = vmul.f32 1.442695, %v252_v22 }
  0xb3   : > { %407 = vpow2.f32 %v253_v23 }
  0xb4   : > { %409 = vpow2.f32 %v255_v24 }
  0xb9   : > { %v408_v25 = vpop.eup %407 }
  0xba   : > { %v410_v26 = vpop.eup %409  ;;  %v257_v27 = vsel %vm241_vm1, %v408_v25, 0.0 }
  0xbb   : > { %v258_v28 = vsel %vm241_vm1, %v410_v26, 0.0 }
  0xbc   : > { %v259_v29 = vadd.f32 %v258_v28, %v257_v27 }
  0xbe   : > { %v260_v30 = vrot.slane %v259_v29, 4 }
  0xc0   : > { %v261_v31 = vadd.f32 %v260_v30, %v259_v29 }
  0xc2   : > { %v262_v32 = vrot.slane %v261_v31, 2 }
  0xc4   : > { %v263_v33 = vadd.f32 %v262_v32, %v261_v31 }
  0xc6   : > { %v264_v34 = vrot.slane %v263_v33, 1 }
  0xc8   : > { %v265_v35 = vadd.f32 %v264_v34, %v263_v33 }
  0xca   : > { %411 = vrcp.f32 %v265_v35  ;;  %v277_v39 = vand.u32 2147483648, %v265_v35  ;;  %v275_v41 = vand.u32 2147483647, %v265_v35  ;;  %vm271_vm3 = vweird.f32 %v265_v35 }
  0xcc   : > { %v278_v43 = vor.u32 1.1754944e-38, %v277_v39  ;;  %vm276_vm5 = vcmp.eq.f32.partialorder %v275_v41, 8.507059e+37 }
  0xd0   : > { %v412_v36 = vpop.eup %411 }
  0xd1   : > { %v267_v37 = vmul.f32 %v412_v36, %v265_v35  ;;  %vm272_vm2 = vweird.f32 %v412_v36 }
  0xd2   : > { %vm273_vm4 = vmor %vm271_vm3, %vm272_vm2 }
  0xd3   : > { %v268_v38 = vsub.f32 1.0, %v267_v37 }
  0xd5   : > { %v269_v40 = vmul.f32 %v412_v36, %v268_v38 }
  0xd7   : > { %v270_v42 = vadd.f32 %v412_v36, %v269_v40 }
  0xd9   : > { %v274_v44 = vsel %vm273_vm4, %v412_v36, %v270_v42 }
  0xda   : > { %v279_v45 = vsel %vm276_vm5, %v278_v43, %v274_v44 }
  0xdb   : > { %v280_v46 = vmul.f32 %v408_v25, %v279_v45  ;;  %v281_v47 = vmul.f32 %v410_v26, %v279_v45 }
  0xdd   : > { %282 = vst.msk [vmem:[%s198_s29] sm:$0xff] %vm241_vm1, %v280_v46 }
  0xde   : > { %283 = vst.msk [vmem:[%s198_s29 + $0x8] sm:$0xff] %vm241_vm1, %v281_v47 }
  0xdf PF: > { %s13_s14 = sadd.s32 1, %s435_s14   ;;  %s514_s12 = smov %s431_s13 }
  0xe0   : > { %p10_p5 = scmp.ge.s32.totalorder %s13_s14, 4   ;;  %s515_s13 = smov %s517_s15 }
  0xe2   :  { %12 = sbr.rel (!%p10_p5) target bundleno = 2 (0x2), region = 62 }

</bundles_post_ra>
